<compile_context>
chip_gen: v7x
topology: tpu7x:2x2x1
jax: 0.10.0
libtpu: 0.0.40
codegen_flags: <defaults>
</compile_context>

<pallas_src>
import jax
import jax.numpy as jnp
from jax import lax
from jax.experimental import pallas as pl
from jax.experimental.pallas import tpu as pltpu

NUM_CLASSES = 10
IMG_SIZE = 28
CHANNELS = 1
IMG_FEATS = IMG_SIZE * IMG_SIZE * CHANNELS  # 784
H1 = 512
H2 = 256
LEAKY_SLOPE = 0.2


def _leaky_relu(x, slope=LEAKY_SLOPE):
    return jnp.where(x > 0, x, slope * x)


def _round_up(x, m):
    return ((x + m - 1) // m) * m


def _pick_batch_tiling(B):
    """Return (b_pad, tile_b).

    Multi-step grids use tile_b % 128 == 0 so the lane-dense (1, tile_b)
    output blocks satisfy the (8, 128) BlockSpec constraint; otherwise a
    single full-batch tile is used (block == full array is always legal).
    Padding is kept to the next multiple of 8 in the common case.
    """
    b8 = _round_up(B, 8)
    if b8 % 256 == 0:
        # Prefer >= 2 grid steps (v7x megacore); cheap on single-TC v5e/v6e.
        for t in (1024, 512, 256, 128):
            if b8 % t == 0 and b8 // t >= 2:
                return b8, t
    if b8 <= 1024:
        return b8, b8
    # Rare fallback for large ragged batches: pad to a multiple of 128 so
    # tiles stay lane-dense and bounded in VMEM.
    b_pad = _round_up(b8, 128)
    for t in (1024, 512, 384, 256, 128):
        if b_pad % t == 0:
            return b_pad, t
    return b_pad, 128


def discriminator_kernel(img_ref, emb_ref, w1i_ref, w1e_ref, b1_ref,
                         w2_ref, b2_ref, w3_ref, b3_ref, o_ref):
    # Layer 1: fused concat -> split matmul.  f32 -> bf16 cast happens here
    # (cheap VPU pack hidden under DMA/MXU) so HBM only ever holds f32 inputs.
    img_bf = img_ref[...].astype(jnp.bfloat16)
    emb_bf = emb_ref[...].astype(jnp.bfloat16)
    h1 = jnp.dot(img_bf, w1i_ref[...], preferred_element_type=jnp.float32)
    h1 = h1 + jnp.dot(emb_bf, w1e_ref[...],
                      preferred_element_type=jnp.float32)
    h1 = _leaky_relu(h1 + b1_ref[...])

    # Layer 2 (512 -> 256), bf16 operands, f32 accumulation.
    h2 = jnp.dot(h1.astype(jnp.bfloat16), w2_ref[...],
                 preferred_element_type=jnp.float32)
    h2 = _leaky_relu(h2 + b2_ref[...])

    # Layer 3 (256 -> 1), computed transposed so the result is lane-dense:
    # contract the 256-dim of w3 (1, 256) against the 256-dim of h2
    # (tile_b, 256) -> (1, tile_b).
    h3 = lax.dot_general(w3_ref[...], h2,
                         dimension_numbers=(((1,), (1,)), ((), ())),
                         preferred_element_type=jnp.float32)
    h3 = h3 + b3_ref[0, 0]

    # Sigmoid: exp + approx reciprocal both ride the EUP slot.
    o_ref[...] = pl.reciprocal(1.0 + jnp.exp(-h3), approx=True)


def discriminator_forward(img, labels, params):
    """img: (B, C, H, W) float32, labels: (B,) int32 -> (B, 1) float32."""
    emb_table, w1_img, w1_emb, b1, w2, b2, w3_row, b3 = params
    B = img.shape[0]

    # Glue: flatten (free reshape) + embedding lookup.  Both stay f32; the
    # bf16 cast happens inside the kernel (single HBM read of the image).
    img_flat = img.reshape(B, -1)
    emb = jnp.take(emb_table, labels, axis=0)

    b_pad, tile_b = _pick_batch_tiling(B)
    if b_pad != B:
        pad = b_pad - B
        img_flat = jnp.pad(img_flat, ((0, pad), (0, 0)))
        emb = jnp.pad(emb, ((0, pad), (0, 0)))
    grid = (b_pad // tile_b,)

    def row_spec(feats):
        return pl.BlockSpec((tile_b, feats), lambda i: (i, 0))

    def pinned(shape):
        # Constant index map -> block DMA'd once, resident across grid steps.
        return pl.BlockSpec(shape, lambda i: (0, 0))

    out = pl.pallas_call(
        discriminator_kernel,
        out_shape=jax.ShapeDtypeStruct((1, b_pad), jnp.float32),
        grid=grid,
        in_specs=[
            row_spec(IMG_FEATS),                 # img_flat (tile_b, 784) f32
            row_spec(NUM_CLASSES),               # emb      (tile_b, 10)  f32
            pinned((IMG_FEATS, H1)),             # w1_img   (784, 512)    bf16
            pinned((NUM_CLASSES, H1)),           # w1_emb   (10, 512)     bf16
            pinned((1, H1)),                     # b1       (1, 512)      f32
            pinned((H1, H2)),                    # w2       (512, 256)    bf16
            pinned((1, H2)),                     # b2       (1, 256)      f32
            pinned((1, H2)),                     # w3_row   (1, 256)      f32
            pl.BlockSpec(memory_space=pltpu.MemorySpace.SMEM),  # b3 (1,1)
        ],
        out_specs=pl.BlockSpec((1, tile_b), lambda i: (0, i)),
        compiler_params=pltpu.CompilerParams(
            dimension_semantics=("parallel",)),
    )(img_flat, emb, w1_img, w1_emb, b1, w2, b2, w3_row, b3)

    # Lane-dense (1, b_pad) kernel output -> (B, 1) module output.
    return jnp.transpose(out)[:B]


def init_params(key):
    """Deterministic parameter init (shapes match the nn.Module)."""
    ks = jax.random.split(key, 7)
    emb_table = jax.random.normal(ks[0], (NUM_CLASSES, NUM_CLASSES), jnp.float32)

    def linear(kw, kb, fan_in, fan_out):
        bound = 1.0 / float(fan_in) ** 0.5
        w = jax.random.uniform(kw, (fan_in, fan_out), jnp.float32, -bound, bound)
        b = jax.random.uniform(kb, (1, fan_out), jnp.float32, -bound, bound)
        return w, b

    w1, b1 = linear(ks[1], ks[2], IMG_FEATS + NUM_CLASSES, H1)
    w2, b2 = linear(ks[3], ks[4], H1, H2)
    w3, b3 = linear(ks[5], ks[6], H2, 1)

    # Split W1 to match concat order [img_flat, emb]; big weights -> bf16.
    w1_img = w1[:IMG_FEATS].astype(jnp.bfloat16)
    w1_emb = w1[IMG_FEATS:].astype(jnp.bfloat16)
    w2 = w2.astype(jnp.bfloat16)
    w3_row = w3.T  # (1, H2), kept f32 (contracted on the MXU in f32)
    return (emb_table, w1_img, w1_emb, b1, w2, b2, w3_row, b3)


def reference_forward(img, labels, params):
    """Pure-JAX reference using matched arithmetic/dtypes (exact sigmoid)."""
    emb_table, w1_img, w1_emb, b1, w2, b2, w3_row, b3 = params
    B = img.shape[0]
    img_flat = img.reshape(B, -1)
    emb = jnp.take(emb_table, labels, axis=0)
    h1 = (jnp.dot(img_flat.astype(jnp.bfloat16), w1_img,
                  preferred_element_type=jnp.float32)
          + jnp.dot(emb.astype(jnp.bfloat16), w1_emb,
                    preferred_element_type=jnp.float32) + b1)
    h1 = _leaky_relu(h1)
    h2 = _leaky_relu(jnp.dot(h1.astype(jnp.bfloat16), w2,
                             preferred_element_type=jnp.float32) + b2)
    h3 = jnp.dot(h2, w3_row.T, preferred_element_type=jnp.float32) + b3[0, 0]
    return jax.nn.sigmoid(h3)


if __name__ == "__main__":
    key = jax.random.PRNGKey(0)
    k_img, k_lab, k_par, k_img2, k_lab2 = jax.random.split(key, 5)
    params = init_params(k_par)

    # Small shapes consistent with the module (MNIST-like 1x28x28 images).
    B = 4
    img = jax.random.normal(k_img, (B, CHANNELS, IMG_SIZE, IMG_SIZE), jnp.float32)
    labels = jax.random.randint(k_lab, (B,), 0, NUM_CLASSES, jnp.int32)

    out = jax.block_until_ready(discriminator_forward(img, labels, params))
    ref = jax.block_until_ready(reference_forward(img, labels, params))
    assert out.shape == (B, 1)
    assert bool(jnp.allclose(out, ref, atol=2e-2, rtol=2e-2))

    # Larger batch: exercises a multi-step batch grid (tile_b=256, 2 steps)
    # with pinned weights and lane-dense output blocks.
    B2 = 512
    img2 = jax.random.normal(k_img2, (B2, CHANNELS, IMG_SIZE, IMG_SIZE),
                             jnp.float32)
    labels2 = jax.random.randint(k_lab2, (B2,), 0, NUM_CLASSES, jnp.int32)
    out2 = jax.block_until_ready(discriminator_forward(img2, labels2, params))
    ref2 = jax.block_until_ready(reference_forward(img2, labels2, params))
    assert out2.shape == (B2, 1)
    assert bool(jnp.allclose(out2, ref2, atol=2e-2, rtol=2e-2))

    print("KERNEL_OK")
</pallas_src>

<mosaic_0001>
module attributes {stable_mosaic.version = 11 : i64} {
  func.func @discriminator_kernel(%arg0: i32, %arg1: memref<8x784xf32, #tpu.memory_space<vmem>>, %arg2: memref<8x10xf32, #tpu.memory_space<vmem>>, %arg3: memref<784x512xbf16, #tpu.memory_space<vmem>>, %arg4: memref<10x512xbf16, #tpu.memory_space<vmem>>, %arg5: memref<1x512xf32, #tpu.memory_space<vmem>>, %arg6: memref<512x256xbf16, #tpu.memory_space<vmem>>, %arg7: memref<1x256xf32, #tpu.memory_space<vmem>>, %arg8: memref<1x256xf32, #tpu.memory_space<vmem>>, %arg9: memref<1x1xf32, #tpu.memory_space<smem>>, %arg10: memref<1x8xf32, #tpu.memory_space<vmem>>) attributes {dimension_semantics = [#tpu.dimension_semantics<parallel>], iteration_bounds = array<i64: 1>, scalar_prefetch = 0 : i64, scratch_operands = 0 : i64, tpu.core_type = #tpu.core_type<tc>, window_params = [{transform_indices = @transform_0, window_bounds = array<i64: 8, 784>}, {transform_indices = @transform_1, window_bounds = array<i64: 8, 10>}, {pipeline_mode = #tpu.pipeline_mode<synchronous>, transform_indices = @transform_2, window_bounds = array<i64: 784, 512>}, {pipeline_mode = #tpu.pipeline_mode<synchronous>, transform_indices = @transform_3, window_bounds = array<i64: 10, 512>}, {pipeline_mode = #tpu.pipeline_mode<synchronous>, transform_indices = @transform_4, window_bounds = array<i64: 1, 512>}, {pipeline_mode = #tpu.pipeline_mode<synchronous>, transform_indices = @transform_5, window_bounds = array<i64: 512, 256>}, {pipeline_mode = #tpu.pipeline_mode<synchronous>, transform_indices = @transform_6, window_bounds = array<i64: 1, 256>}, {pipeline_mode = #tpu.pipeline_mode<synchronous>, transform_indices = @transform_7, window_bounds = array<i64: 1, 256>}, {transform_indices = @transform_8, window_bounds = array<i64: 1, 1>}, {transform_indices = @transform_9, window_bounds = array<i64: 1, 8>}]} {
    %c0 = arith.constant 0 : index
    %c0_0 = arith.constant 0 : index
    %0 = vector.load %arg1[%c0, %c0_0] : memref<8x784xf32, #tpu.memory_space<vmem>>, vector<8x784xf32>
    %1 = arith.truncf %0 : vector<8x784xf32> to vector<8x784xbf16>
    %c0_1 = arith.constant 0 : index
    %c0_2 = arith.constant 0 : index
    %2 = vector.load %arg2[%c0_1, %c0_2] : memref<8x10xf32, #tpu.memory_space<vmem>>, vector<8x10xf32>
    %3 = arith.truncf %2 : vector<8x10xf32> to vector<8x10xbf16>
    %c0_3 = arith.constant 0 : index
    %c0_4 = arith.constant 0 : index
    %4 = vector.load %arg3[%c0_3, %c0_4] : memref<784x512xbf16, #tpu.memory_space<vmem>>, vector<784x512xbf16>
    %cst = arith.constant dense<0.000000e+00> : vector<8x512xf32>
    %5 = tpu.matmul %1, %4, %cst {dimension_numbers = #tpu.dot_dimension_numbers<[1], [0], [0], [1], [0, 0, 1, 1], [], []>} : vector<8x784xbf16>, vector<784x512xbf16>, vector<8x512xf32> -> vector<8x512xf32>
    %c0_5 = arith.constant 0 : index
    %c0_6 = arith.constant 0 : index
    %6 = vector.load %arg4[%c0_5, %c0_6] : memref<10x512xbf16, #tpu.memory_space<vmem>>, vector<10x512xbf16>
    %cst_7 = arith.constant dense<0.000000e+00> : vector<8x512xf32>
    %7 = tpu.matmul %3, %6, %cst_7 {dimension_numbers = #tpu.dot_dimension_numbers<[1], [0], [0], [1], [0, 0, 1, 1], [], []>} : vector<8x10xbf16>, vector<10x512xbf16>, vector<8x512xf32> -> vector<8x512xf32>
    %8 = arith.addf %5, %7 : vector<8x512xf32>
    %c0_8 = arith.constant 0 : index
    %c0_9 = arith.constant 0 : index
    %9 = vector.load %arg5[%c0_8, %c0_9] : memref<1x512xf32, #tpu.memory_space<vmem>>, vector<1x512xf32>
    %10 = vector.broadcast %9 : vector<1x512xf32> to vector<8x512xf32>
    %11 = arith.addf %8, %10 : vector<8x512xf32>
    %cst_10 = arith.constant 0.000000e+00 : f32
    %12 = vector.broadcast %cst_10 : f32 to vector<8x512xf32>
    %13 = arith.cmpf ogt, %11, %12 : vector<8x512xf32>
    %cst_11 = arith.constant 2.000000e-01 : f32
    %14 = vector.broadcast %cst_11 : f32 to vector<8x512xf32>
    %15 = arith.mulf %14, %11 : vector<8x512xf32>
    %16 = arith.select %13, %11, %15 : vector<8x512xi1>, vector<8x512xf32>
    %17 = arith.truncf %16 : vector<8x512xf32> to vector<8x512xbf16>
    %c0_12 = arith.constant 0 : index
    %c0_13 = arith.constant 0 : index
    %18 = vector.load %arg6[%c0_12, %c0_13] : memref<512x256xbf16, #tpu.memory_space<vmem>>, vector<512x256xbf16>
    %cst_14 = arith.constant dense<0.000000e+00> : vector<8x256xf32>
    %19 = tpu.matmul %17, %18, %cst_14 {dimension_numbers = #tpu.dot_dimension_numbers<[1], [0], [0], [1], [0, 0, 1, 1], [], []>} : vector<8x512xbf16>, vector<512x256xbf16>, vector<8x256xf32> -> vector<8x256xf32>
    %c0_15 = arith.constant 0 : index
    %c0_16 = arith.constant 0 : index
    %20 = vector.load %arg7[%c0_15, %c0_16] : memref<1x256xf32, #tpu.memory_space<vmem>>, vector<1x256xf32>
    %21 = vector.broadcast %20 : vector<1x256xf32> to vector<8x256xf32>
    %22 = arith.addf %19, %21 : vector<8x256xf32>
    %cst_17 = arith.constant 0.000000e+00 : f32
    %23 = vector.broadcast %cst_17 : f32 to vector<8x256xf32>
    %24 = arith.cmpf ogt, %22, %23 : vector<8x256xf32>
    %cst_18 = arith.constant 2.000000e-01 : f32
    %25 = vector.broadcast %cst_18 : f32 to vector<8x256xf32>
    %26 = arith.mulf %25, %22 : vector<8x256xf32>
    %27 = arith.select %24, %22, %26 : vector<8x256xi1>, vector<8x256xf32>
    %c0_19 = arith.constant 0 : index
    %c0_20 = arith.constant 0 : index
    %28 = vector.load %arg8[%c0_19, %c0_20] : memref<1x256xf32, #tpu.memory_space<vmem>>, vector<1x256xf32>
    %cst_21 = arith.constant dense<0.000000e+00> : vector<1x8xf32>
    %29 = tpu.matmul %28, %27, %cst_21 {dimension_numbers = #tpu.dot_dimension_numbers<[1], [1], [0], [0], [0, 0, 1, 0], [], []>} : vector<1x256xf32>, vector<8x256xf32>, vector<1x8xf32> -> vector<1x8xf32>
    %c0_22 = arith.constant 0 : index
    %c0_23 = arith.constant 0 : index
    %30 = memref.load %arg9[%c0_22, %c0_23] : memref<1x1xf32, #tpu.memory_space<smem>>
    %31 = vector.broadcast %30 : f32 to vector<1x8xf32>
    %32 = arith.addf %29, %31 : vector<1x8xf32>
    %cst_24 = arith.constant 0.000000e+00 : f32
    %33 = vector.broadcast %cst_24 : f32 to vector<1x8xf32>
    %34 = arith.subf %33, %32 : vector<1x8xf32>
    %35 = math.exp %34 : vector<1x8xf32>
    %cst_25 = arith.constant 1.000000e+00 : f32
    %36 = vector.broadcast %cst_25 : f32 to vector<1x8xf32>
    %37 = arith.addf %36, %35 : vector<1x8xf32>
    %38 = tpu.reciprocal %37 {approx = true} : vector<1x8xf32> -> vector<1x8xf32>
    %c0_26 = arith.constant 0 : index
    %c0_27 = arith.constant 0 : index
    %39 = vector.load %arg10[%c0_26, %c0_27] : memref<1x8xf32, #tpu.memory_space<vmem>>, vector<1x8xf32>
    tpu.vector_store %arg10[%c0_26, %c0_27], %38 {strides = array<i32>} : memref<1x8xf32, #tpu.memory_space<vmem>>, vector<1x8xf32>,
    return
  }
  func.func @transform_0(%arg0: i32) -> (i32, i32) {
    %c0_i32 = arith.constant 0 : i32
    %c0_i32_0 = arith.constant 0 : i32
    return %arg0, %c0_i32 : i32, i32
  }
  func.func @transform_1(%arg0: i32) -> (i32, i32) {
    %c0_i32 = arith.constant 0 : i32
    %c0_i32_0 = arith.constant 0 : i32
    return %arg0, %c0_i32 : i32, i32
  }
  func.func @transform_2(%arg0: i32) -> (i32, i32) {
    %c0_i32 = arith.constant 0 : i32
    %c0_i32_0 = arith.constant 0 : i32
    %c0_i32_1 = arith.constant 0 : i32
    return %c0_i32, %c0_i32_0 : i32, i32
  }
  func.func @transform_3(%arg0: i32) -> (i32, i32) {
    %c0_i32 = arith.constant 0 : i32
    %c0_i32_0 = arith.constant 0 : i32
    %c0_i32_1 = arith.constant 0 : i32
    return %c0_i32, %c0_i32_0 : i32, i32
  }
  func.func @transform_4(%arg0: i32) -> (i32, i32) {
    %c0_i32 = arith.constant 0 : i32
    %c0_i32_0 = arith.constant 0 : i32
    %c0_i32_1 = arith.constant 0 : i32
    return %c0_i32, %c0_i32_0 : i32, i32
  }
  func.func @transform_5(%arg0: i32) -> (i32, i32) {
    %c0_i32 = arith.constant 0 : i32
    %c0_i32_0 = arith.constant 0 : i32
    %c0_i32_1 = arith.constant 0 : i32
    return %c0_i32, %c0_i32_0 : i32, i32
  }
  func.func @transform_6(%arg0: i32) -> (i32, i32) {
    %c0_i32 = arith.constant 0 : i32
    %c0_i32_0 = arith.constant 0 : i32
    %c0_i32_1 = arith.constant 0 : i32
    return %c0_i32, %c0_i32_0 : i32, i32
  }
  func.func @transform_7(%arg0: i32) -> (i32, i32) {
    %c0_i32 = arith.constant 0 : i32
    %c0_i32_0 = arith.constant 0 : i32
    %c0_i32_1 = arith.constant 0 : i32
    return %c0_i32, %c0_i32_0 : i32, i32
  }
  func.func @transform_8(%arg0: i32) -> (i32, i32) {
    %c0_i32 = arith.constant 0 : i32
    %c0_i32_0 = arith.constant 0 : i32
    %c0_i32_1 = arith.constant 0 : i32
    return %c0_i32, %c0_i32_0 : i32, i32
  }
  func.func @transform_9(%arg0: i32) -> (i32, i32) {
    %c0_i32 = arith.constant 0 : i32
    %c0_i32_0 = arith.constant 0 : i32
    return %c0_i32, %arg0 : i32, i32
  }
}

</mosaic_0001>

<bundles_post_ra>
// kernel: tpu_custom_call.1
= control target key start
LH: loop header
LB: loop body
LE: loop exit
PB: predicated region body
PF: predicated region fallthrough
CT: control target
= control target key end

     0   :  { %15 = vsyncpa [#allocation4], 0  ;;  %s3422_s0 = inlined_call_operand.hbm [shape: f32[8,784], index: 0, kind: input, shape index: {}]   ;;  %s3423_s1 = inlined_call_operand.hbm [shape: f32[8,10], index: 1, kind: input, shape index: {}]   ;;  %s3424_s2 = inlined_call_operand.hbm [shape: bf16[784,512], index: 2, kind: input, shape index: {}]   ;;  %s3425_s3 = inlined_call_operand.hbm [shape: bf16[10,512], index: 3, kind: input, shape index: {}]   ;;  %s3426_s4 = inlined_call_operand.vmem [shape: f32[1,512], index: 4, kind: input, shape index: {}]   ;;  %s3427_s5 = inlined_call_operand.hbm [shape: bf16[512,256], index: 5, kind: input, shape index: {}]   ;;  %s3428_s6 = inlined_call_operand.vmem [shape: f32[1,256], index: 6, kind: input, shape index: {}]   ;;  %s3429_s7 = inlined_call_operand.vmem [shape: f32[1,256], index: 7, kind: input, shape index: {}]   ;;  %s3430_s8 = inlined_call_operand.<no memory space> [shape: f32[1,1], index: 8, kind: input, shape index: {}]   ;;  %s3431_s9 = inlined_call_operand.hbm [shape: f32[1,8], index: 9, kind: output, shape index: {}]  }
   0x1   :  { %16 = vsyncpa [#allocation7], 0 }
   0x2   :  { %17 = vsyncpa [#allocation10], 0 }
   0x3   :  { %18 = vsyncpa [#allocation5], 0  ;;  %s3203_s30 = smov [#allocation6]   ;;  %s3063_s13 = scalar_lea.hbm %s3423_s1, 128 }
   0x4   :  { %s35_s10 = sshll.u32 %s3203_s30, 4  ;;  %p3064_p0 = scmp.ne.s32.totalorder %s3423_s1, %s3063_s13  ;;  %s36_s10 = int_to_ptr.vmem [resolvable:$true] %s35_s10 }
   0x5   :  { %p3067_p1 = scmp.lt.u32.totalorder %s3063_s13, %s3423_s1 }
   0x7   :  { %p3069_p2 = pnand %p3067_p1, %p3064_p0 }
   0x9   :  { %3072 = shalt.err (!%p3069_p2)
}
   0xa   :  { %s3073_s18 = scalar_lea.vmem %s36_s10, 128  ;;  %p3078_p4 = scmp.lt.s32.totalorder %s36_s10, %s36_s10 }
   0xb   :  { %p3074_p3 = scmp.ne.s32.totalorder %s36_s10, %s3073_s18  ;;  %p3079_p5 = scmp.lt.s32.totalorder %s3073_s18, %s3073_s18 }
   0xd   :  { %p3080_p6 = por %p3079_p5, %p3078_p4 }
   0xf   :  { %p3081_p7 = pnand %p3080_p6, %p3074_p3 }
  0x11   :  { %3084 = shalt.err (!%p3081_p7)
}
  0x12   :  { %38 = dma.hbm_to_vmem [thread:$0]  %s3423_s1, 128, %s36_s10, [#allocation7]  }
  0x13   :  { %s3204_s21 = smov [#allocation9]   ;;  %s3205_s23 = smov [#allocation3]  }
  0x14   :  { %s56_s22 = sshll.u32 %s3204_s21, 4  ;;  %s25_s24 = sshll.u32 %s3205_s23, 4  ;;  %s57_s22 = int_to_ptr.vmem [resolvable:$true] %s56_s22  ;;  %s26_s24 = int_to_ptr.vmem [resolvable:$true] %s25_s24 }
  0x15   :  { %s3085_s27 = scalar_lea.hbm %s3425_s3, 512 }
  0x16   :  { %p3086_p8 = scmp.ne.s32.totalorder %s3425_s3, %s3085_s27  ;;  %p3089_p9 = scmp.lt.u32.totalorder %s3085_s27, %s3425_s3 }
  0x18   :  { %p3091_p10 = pnand %p3089_p9, %p3086_p8 }
  0x1a   :  { %3094 = shalt.err (!%p3091_p10)
}
  0x1b   :  { %s3095_s1 = scalar_lea.vmem %s57_s22, 512  ;;  %p3100_p12 = scmp.lt.s32.totalorder %s57_s22, %s57_s22 }
  0x1c   :  { %p3096_p11 = scmp.ne.s32.totalorder %s57_s22, %s3095_s1  ;;  %p3101_p13 = scmp.lt.s32.totalorder %s3095_s1, %s3095_s1 }
  0x1e   :  { %p3102_p0 = por %p3101_p13, %p3100_p12 }
  0x20   :  { %p3103_p1 = pnand %p3102_p0, %p3096_p11 }
  0x22   :  { %3106 = shalt.err (!%p3103_p1)
}
  0x23   :  { %s3206_s10 = smov 256   ;;  %s3207_s12 = smov 16  }
  0x24   :  { %62 = dma.hbm_to_vmem [thread:$0]  %s3425_s3, 512, %s57_s22, [#allocation10], %s3206_s10, %s3206_s10, %s3207_s12  }
  0x25   :  { %s3107_s17 = scalar_lea.hbm %s3422_s0, 896 }
  0x26   :  { %p3108_p2 = scmp.ne.s32.totalorder %s3422_s0, %s3107_s17  ;;  %p3111_p3 = scmp.lt.u32.totalorder %s3107_s17, %s3422_s0 }
  0x28   :  { %p3113_p4 = pnand %p3111_p3, %p3108_p2 }
  0x2a   :  { %3116 = shalt.err (!%p3113_p4)
}
  0x2b   :  { %s3117_s23 = scalar_lea.vmem %s26_s24, 896  ;;  %p3122_p6 = scmp.lt.s32.totalorder %s26_s24, %s26_s24 }
  0x2c   :  { %p3118_p5 = scmp.ne.s32.totalorder %s26_s24, %s3117_s23  ;;  %p3123_p7 = scmp.lt.s32.totalorder %s3117_s23, %s3117_s23 }
  0x2e   :  { %p3124_p8 = por %p3123_p7, %p3122_p6 }
  0x30   :  { %p3125_p9 = pnand %p3124_p8, %p3118_p5 }
  0x32   :  { %3128 = shalt.err (!%p3125_p9)
}
  0x33   :  { %28 = dma.hbm_to_vmem [thread:$0]  %s3422_s0, 896, %s26_s24, [#allocation4]  }
  0x34   :  { %s3208_s25 = smov [#allocation8]   ;;  %s3209_s27 = smov [#allocation11]  }
  0x35   :  { %s44_s26 = sshll.u32 %s3208_s25, 4  ;;  %s70_s28 = sshll.u32 %s3209_s27, 4  ;;  %s45_s26 = int_to_ptr.vmem [resolvable:$true] %s44_s26  ;;  %s71_s28 = int_to_ptr.vmem [resolvable:$true] %s70_s28 }
  0x36   :  { %s3129_s11 = scalar_lea.hbm %s3424_s2, 25088 }
  0x37   :  { %p3130_p10 = scmp.ne.s32.totalorder %s3424_s2, %s3129_s11  ;;  %p3133_p11 = scmp.lt.u32.totalorder %s3129_s11, %s3424_s2 }
  0x39   :  { %p3135_p12 = pnand %p3133_p11, %p3130_p10 }
  0x3b   :  { %3138 = shalt.err (!%p3135_p12)
}
  0x3c   :  { %s3139_s0 = scalar_lea.vmem %s45_s26, 25088  ;;  %p3144_p0 = scmp.lt.s32.totalorder %s45_s26, %s45_s26 }
  0x3d   :  { %p3140_p13 = scmp.ne.s32.totalorder %s45_s26, %s3139_s0  ;;  %p3145_p1 = scmp.lt.s32.totalorder %s3139_s0, %s3139_s0 }
  0x3f   :  { %p3146_p2 = por %p3145_p1, %p3144_p0 }
  0x41   :  { %p3147_p3 = pnand %p3146_p2, %p3140_p13 }
  0x43   :  { %3150 = shalt.err (!%p3147_p3)
}
  0x44   :  { %50 = dma.hbm_to_vmem [thread:$0]  %s3424_s2, 25088, %s45_s26, [#allocation7], %s3206_s10, %s3206_s10, %s3207_s12  }
  0x45   :  { %s3151_s19 = scalar_lea.hbm %s3427_s5, 8192 }
  0x46   :  { %p3152_p4 = scmp.ne.s32.totalorder %s3427_s5, %s3151_s19  ;;  %p3155_p5 = scmp.lt.u32.totalorder %s3151_s19, %s3427_s5 }
  0x48   :  { %p3157_p6 = pnand %p3155_p5, %p3152_p4 }
  0x4a   :  { %3160 = shalt.err (!%p3157_p6)
}
  0x4b   :  { %s3161_s22 = scalar_lea.vmem %s71_s28, 8192  ;;  %p3166_p8 = scmp.lt.s32.totalorder %s71_s28, %s71_s28 }
  0x4c   :  { %p3162_p7 = scmp.ne.s32.totalorder %s71_s28, %s3161_s22  ;;  %p3167_p9 = scmp.lt.s32.totalorder %s3161_s22, %s3161_s22 }
  0x4e   :  { %p3168_p10 = por %p3167_p9, %p3166_p8 }
  0x50   :  { %p3169_p11 = pnand %p3168_p10, %p3162_p7 }
  0x52   :  { %3172 = shalt.err (!%p3169_p11)
}
  0x53   :  { %s3210_s2 = smov 128   ;;  %s3211_s10 = smov 8  }
  0x54   :  { %76 = dma.hbm_to_vmem [thread:$0]  %s3427_s5, 8192, %s71_s28, [#allocation10], %s3210_s2, %s3210_s2, %s3211_s10  }
  0x55   :  { %3195 = dma.done.wait [#allocation4], 896  }
  0x56   :  { %3196 = vsyncadd [#allocation4], 4294966400 }
  0x57   :  { %3197 = dma.done.wait [#allocation7], 25216  }
  0x58   :  { %3198 = vsyncadd [#allocation7], 4294942080 }
  0x59   :  { %3199 = dma.done.wait [#allocation10], 8704  }
  0x5a   :  { %3200 = vsyncadd [#allocation10], 4294958592  ;;  %v3212_v0 = vmov 0   ;;  %vm335_vm0 = vcmask 1044480   ;;  %v113_v3 = vld [vmem:[#allocation6] sm:$0xff]  ;;  %vm331_vm1 = vcmask 80896  }
  0x5b   :  { %421 = vmatprep.mubr.bf16.mxu1 %v3212_v0  ;;  %380 = vmatprep.mubr.bf16.mxu0 %v3212_v0  ;;  %v2663_v1 = vld [vmem:[#allocation9 + $0xc] ss:$16 sps:$4 sm:$0x1f]   ;;  %v2665_v2 = vld [vmem:[#allocation9 + $0x8] ss:$16 sps:$4 sm:$0x1f]   ;;  %v114_v6 = vpack.c.bf16 %v113_v3, %v113_v3 }
  0x5c   :  { %2382 = vmatprep.subr.msk.bf16.mxu1 %vm335_vm0, %v2663_v1  ;;  %v2668_v4 = vld [vmem:[#allocation8 + $0x4] ss:$16 sps:$4 sm:$0xff]   ;;  %v343_v5 = vsel %vm335_vm0, %v2665_v2, 0  ;;  %v2666_v7 = vld [vmem:[#allocation8] ss:$16 sps:$4 sm:$0xff]   ;;  %v100_v20 = vld [vmem:[#allocation3 + $0x8] sm:$0xff] }
  0x5d   :  { %390 = vmatpush1.bf16.msra.mxu1 %v343_v5  ;;  %v2671_v8 = vld [vmem:[#allocation8 + $0x24] ss:$16 sps:$4 sm:$0xff]   ;;  %v2669_v9 = vld [vmem:[#allocation8 + $0x20] ss:$16 sps:$4 sm:$0xff]   ;;  %v3336_v22 = vpack.c.bf16 %v100_v20, %v100_v20  ;;  %v102_v5 = vld [vmem:[#allocation3 + $0x18] sm:$0xff]  ;;  %vm1410_vm2 = vcmask 130048  }
  0x5e   :  { %1414 = vmatprep.subr.bf16.mxu1 %v2668_v4  ;;  %v2674_v10 = vld [vmem:[#allocation8 + $0x44] ss:$16 sps:$4 sm:$0xff]   ;;  %v2672_v11 = vld [vmem:[#allocation8 + $0x40] ss:$16 sps:$4 sm:$0xff]   ;;  %s3213_s30 = smov [#allocation12]   ;;  %vm2357_vm9 = vcmask 57344  }
  0x5f   :  { %v2677_v12 = vld [vmem:[#allocation8 + $0x64] ss:$16 sps:$4 sm:$0xff]   ;;  %v2675_v13 = vld [vmem:[#allocation8 + $0x60] ss:$16 sps:$4 sm:$0xff]   ;;  %s2365_s11 = sshll.u32 %s3213_s30, 4  ;;  %s2366_s11 = int_to_ptr.vmem [resolvable:$true] %s2365_s11 }
  0x60   :  { %2383 = vmatmul.mubr.msk.bf16.vlgmr.msra.gmra.mrb[0].mxu1 %vm331_vm1, %v114_v6  ;;  %v2680_v14 = vld [vmem:[#allocation8 + $0x84] ss:$16 sps:$4 sm:$0xff]   ;;  %v2678_v15 = vld [vmem:[#allocation8 + $0x80] ss:$16 sps:$4 sm:$0xff]   ;;  %s3173_s1 = scalar_lea.vmem %s2366_s11, 16  ;;  %s3177_s13 = scalar_lea.vmem %s2366_s11, 32 }
  0x61   :  { %1415 = vmatpush1.bf16.msra.mxu1 %v2666_v7  ;;  %v2683_v16 = vld [vmem:[#allocation8 + $0xa4] ss:$16 sps:$4 sm:$0xff]   ;;  %v2681_v18 = vld [vmem:[#allocation8 + $0xa0] ss:$16 sps:$4 sm:$0xff]   ;;  %1446 = vmatprep.mubr.bf16.mxu1 %v3336_v22  ;;  %p3174_p12 = scmp.ne.s32.totalorder %s2366_s11, %s3173_s1  ;;  %p3178_p13 = scmp.lt.s32.totalorder %s2366_s11, %s2366_s11 }
  0x62   :  { %1416 = vmatprep.subr.bf16.mxu1 %v2671_v8  ;;  %v2711_v17 = vld [vmem:[#allocation9 + $0x4] ss:$16 sps:$4 sm:$0x1f]   ;;  %v2716_v19 = vld [vmem:[#allocation9] ss:$16 sps:$4 sm:$0x1f]   ;;  %p3179_p0 = scmp.lt.s32.totalorder %s3177_s13, %s3173_s1 }
  0x63   :  { %2380 = vmatprep.subr.msk.bf16.mxu0 %vm335_vm0, %v2711_v17  ;;  %v2686_v21 = vld [vmem:[#allocation8 + $0xc4] ss:$16 sps:$4 sm:$0xff]   ;;  %v337_v23 = vsel %vm335_vm0, %v2716_v19, 0  ;;  %v2720_v24 = vld [vmem:[#allocation8 + $0x400] ss:$16 sps:$4 sm:$0xff]   ;;  %v104_v8 = vld [vmem:[#allocation3 + $0x28] sm:$0xff] }
  0x64   :  { %349 = vmatpush1.bf16.msra.mxu0 %v337_v23  ;;  %v2722_v25 = vld [vmem:[#allocation8 + $0x404] ss:$16 sps:$4 sm:$0xff]   ;;  %v2684_v26 = vld [vmem:[#allocation8 + $0xc0] ss:$16 sps:$4 sm:$0xff]   ;;  %p3180_p1 = por %p3179_p0, %p3178_p13 }
  0x65   :  { %1417 = vmatpush1.bf16.msra.mxu1 %v2669_v9  ;;  %v2689_v27 = vld [vmem:[#allocation8 + $0xe4] ss:$16 sps:$4 sm:$0xff]   ;;  %1496 = vmatprep.subr.bf16.mxu0 %v2722_v25  ;;  %v2726_v29 = vld [vmem:[#allocation8 + $0x420] ss:$16 sps:$4 sm:$0xff]  }
  0x66   :  { %1418 = vmatprep.subr.bf16.mxu1 %v2674_v10  ;;  %v2728_v28 = vld [vmem:[#allocation8 + $0x424] ss:$16 sps:$4 sm:$0xff]   ;;  %v2687_v30 = vld [vmem:[#allocation8 + $0xe0] ss:$16 sps:$4 sm:$0xff]   ;;  %v109_v10 = vpack.c.bf16 %v102_v5, %v102_v5  ;;  %p3181_p2 = pnand %p3180_p1, %p3174_p12 }
  0x67   :  { %2381 = vmatmul.mubr.msk.bf16.vlgmr.msra.gmra.mrb[0].mxu0 %vm331_vm1, %v114_v6  ;;  %v2734_v31 = vld [vmem:[#allocation8 + $0x444] ss:$16 sps:$4 sm:$0xff]   ;;  %v2732_v33 = vld [vmem:[#allocation8 + $0x440] ss:$16 sps:$4 sm:$0xff]  }
  0x68   :  { %1497 = vmatpush1.bf16.msra.mxu0 %v2720_v24  ;;  %v2692_v32 = vld [vmem:[#allocation8 + $0x104] ss:$16 sps:$4 sm:$0xff]   ;;  %v2690_v34 = vld [vmem:[#allocation8 + $0x100] ss:$16 sps:$4 sm:$0xff]  }
  0x69   :  { %1419 = vmatpush1.bf16.msra.mxu1 %v2672_v11  ;;  %1498 = vmatprep.subr.bf16.mxu0 %v2728_v28  ;;  %v2740_v35 = vld [vmem:[#allocation8 + $0x464] ss:$16 sps:$4 sm:$0xff]   ;;  %v2738_v37 = vld [vmem:[#allocation8 + $0x460] ss:$16 sps:$4 sm:$0xff]   ;;  %v3343_v11 = vpack.c.bf16 %v104_v8, %v104_v8 }
  0x6a   :  { %1420 = vmatprep.subr.bf16.mxu1 %v2677_v12  ;;  %v2695_v36 = vld [vmem:[#allocation8 + $0x124] ss:$16 sps:$4 sm:$0xff]   ;;  %v2693_v38 = vld [vmem:[#allocation8 + $0x120] ss:$16 sps:$4 sm:$0xff]  }
  0x6b   :  { %v2746_v39 = vld [vmem:[#allocation8 + $0x484] ss:$16 sps:$4 sm:$0xff]   ;;  %v2744_v41 = vld [vmem:[#allocation8 + $0x480] ss:$16 sps:$4 sm:$0xff]   ;;  %1528 = vmatprep.mubr.bf16.mxu0 %v3343_v11 }
  0x6c   :  { %1499 = vmatpush1.bf16.msra.mxu0 %v2726_v29  ;;  %v2698_v40 = vld [vmem:[#allocation8 + $0x144] ss:$16 sps:$4 sm:$0xff]   ;;  %v2696_v42 = vld [vmem:[#allocation8 + $0x140] ss:$16 sps:$4 sm:$0xff]  }
  0x6d   :  { %1421 = vmatpush1.bf16.msra.mxu1 %v2675_v13  ;;  %1500 = vmatprep.subr.bf16.mxu0 %v2734_v31  ;;  %v2752_v43 = vld [vmem:[#allocation8 + $0x4a4] ss:$16 sps:$4 sm:$0xff]   ;;  %v2750_v45 = vld [vmem:[#allocation8 + $0x4a0] ss:$16 sps:$4 sm:$0xff]  }
  0x6e   :  { %1422 = vmatprep.subr.bf16.mxu1 %v2680_v14  ;;  %v2701_v44 = vld [vmem:[#allocation8 + $0x164] ss:$16 sps:$4 sm:$0xff]   ;;  %v2699_v46 = vld [vmem:[#allocation8 + $0x160] ss:$16 sps:$4 sm:$0xff]  }
  0x6f   :  { %v2758_v47 = vld [vmem:[#allocation8 + $0x4c4] ss:$16 sps:$4 sm:$0xff]   ;;  %v2756_v49 = vld [vmem:[#allocation8 + $0x4c0] ss:$16 sps:$4 sm:$0xff]  }
  0x70   :  { %1501 = vmatpush1.bf16.msra.mxu0 %v2732_v33  ;;  %v2704_v48 = vld [vmem:[#allocation8 + $0x184] ss:$16 sps:$4 sm:$0xff]   ;;  %v2702_v50 = vld [vmem:[#allocation8 + $0x180] ss:$16 sps:$4 sm:$0xff]  }
  0x71   :  { %1423 = vmatpush1.bf16.msra.mxu1 %v2678_v15  ;;  %1502 = vmatprep.subr.bf16.mxu0 %v2740_v35  ;;  %v2764_v51 = vld [vmem:[#allocation8 + $0x4e4] ss:$16 sps:$4 sm:$0xff]   ;;  %v2762_v53 = vld [vmem:[#allocation8 + $0x4e0] ss:$16 sps:$4 sm:$0xff]  }
  0x72   :  { %1424 = vmatprep.subr.bf16.mxu1 %v2683_v16  ;;  %v2707_v52 = vld [vmem:[#allocation8 + $0x1a4] ss:$16 sps:$4 sm:$0xff]   ;;  %v2705_v54 = vld [vmem:[#allocation8 + $0x1a0] ss:$16 sps:$4 sm:$0xff]  }
  0x73   :  { %v2770_v55 = vld [vmem:[#allocation8 + $0x504] ss:$16 sps:$4 sm:$0xff]   ;;  %v2768_v57 = vld [vmem:[#allocation8 + $0x500] ss:$16 sps:$4 sm:$0xff]  }
  0x74   :  { %1503 = vmatpush1.bf16.msra.mxu0 %v2738_v37  ;;  %v2710_v56 = vld [vmem:[#allocation8 + $0x1c4] ss:$16 sps:$4 sm:$0xff]   ;;  %v2708_v58 = vld [vmem:[#allocation8 + $0x1c0] ss:$16 sps:$4 sm:$0xff]   ;;  %v2827_v37 = vld [vmem:[#allocation8 + $0x22c] ss:$16 sps:$4 sm:$0xff]  }
  0x75   :  { %1425 = vmatpush1.bf16.msra.mxu1 %v2681_v18  ;;  %1504 = vmatprep.subr.bf16.mxu0 %v2746_v39  ;;  %v2776_v59 = vld [vmem:[#allocation8 + $0x524] ss:$16 sps:$4 sm:$0xff]   ;;  %v2713_v61 = vld [vmem:[#allocation8 + $0x1e0] ss:$16 sps:$4 sm:$0xff]  }
  0x76   :  { %1426 = vmatprep.subr.bf16.mxu1 %v2686_v21  ;;  %v2715_v60 = vld [vmem:[#allocation8 + $0x1e4] ss:$16 sps:$4 sm:$0xff]   ;;  %v2774_v62 = vld [vmem:[#allocation8 + $0x520] ss:$16 sps:$4 sm:$0xff]  }
  0x77   :  { %v99_v63 = vld [vmem:[#allocation3] sm:$0xff] }
  0x78   :  { %1505 = vmatpush1.bf16.msra.mxu0 %v2744_v41  ;;  %v2782_v1 = vld [vmem:[#allocation8 + $0x544] ss:$16 sps:$4 sm:$0xff]   ;;  %v3341_v3 = vpack.c.bf16 %v99_v63, %v99_v63  ;;  %v2780_v4 = vld [vmem:[#allocation8 + $0x540] ss:$16 sps:$4 sm:$0xff]   ;;  %v2833_v41 = vld [vmem:[#allocation8 + $0x24c] ss:$16 sps:$4 sm:$0xff]  }
  0x79   :  { %1427 = vmatpush1.bf16.msra.mxu1 %v2684_v26  ;;  %1506 = vmatprep.subr.bf16.mxu0 %v2752_v43  ;;  %v2719_v2 = vld [vmem:[#allocation8 + $0x204] ss:$16 sps:$4 sm:$0xff]   ;;  %v2717_v6 = vld [vmem:[#allocation8 + $0x200] ss:$16 sps:$4 sm:$0xff]  }
  0x7a   :  { %1428 = vmatprep.subr.bf16.mxu1 %v2689_v27  ;;  %v2788_v7 = vld [vmem:[#allocation8 + $0x564] ss:$16 sps:$4 sm:$0xff]   ;;  %v2723_v12 = vld [vmem:[#allocation8 + $0x220] ss:$16 sps:$4 sm:$0xff]  }
  0x7b   :  { %v2725_v9 = vld [vmem:[#allocation8 + $0x224] ss:$16 sps:$4 sm:$0xff]   ;;  %v2786_v13 = vld [vmem:[#allocation8 + $0x560] ss:$16 sps:$4 sm:$0xff]  }
  0x7c   :  { %1507 = vmatpush1.bf16.msra.mxu0 %v2750_v45  ;;  %v2794_v14 = vld [vmem:[#allocation8 + $0x584] ss:$16 sps:$4 sm:$0xff]   ;;  %v2729_v16 = vld [vmem:[#allocation8 + $0x240] ss:$16 sps:$4 sm:$0xff]   ;;  %v2839_v45 = vld [vmem:[#allocation8 + $0x26c] ss:$16 sps:$4 sm:$0xff]  }
  0x7d   :  { %1429 = vmatpush1.bf16.msra.mxu1 %v2687_v30  ;;  %1508 = vmatprep.subr.bf16.mxu0 %v2758_v47  ;;  %v2731_v15 = vld [vmem:[#allocation8 + $0x244] ss:$16 sps:$4 sm:$0xff]   ;;  %v2792_v17 = vld [vmem:[#allocation8 + $0x580] ss:$16 sps:$4 sm:$0xff]  }
  0x7e   :  { %1430 = vmatprep.subr.bf16.mxu1 %v2692_v32  ;;  %v2800_v18 = vld [vmem:[#allocation8 + $0x5a4] ss:$16 sps:$4 sm:$0xff]   ;;  %v2735_v20 = vld [vmem:[#allocation8 + $0x260] ss:$16 sps:$4 sm:$0xff]   ;;  %v2821_v32 = vld [vmem:[#allocation8 + $0x20c] ss:$16 sps:$4 sm:$0xff]  }
  0x7f   :  { %v2737_v19 = vld [vmem:[#allocation8 + $0x264] ss:$16 sps:$4 sm:$0xff]   ;;  %v2798_v21 = vld [vmem:[#allocation8 + $0x5a0] ss:$16 sps:$4 sm:$0xff]  }
  0x80   :  { %1509 = vmatpush1.bf16.msra.mxu0 %v2756_v49  ;;  %v2806_v23 = vld [vmem:[#allocation8 + $0x5c4] ss:$16 sps:$4 sm:$0xff]   ;;  %v2741_v25 = vld [vmem:[#allocation8 + $0x280] ss:$16 sps:$4 sm:$0xff]   ;;  %v2845_v49 = vld [vmem:[#allocation8 + $0x28c] ss:$16 sps:$4 sm:$0xff]  }
  0x81   :  { %1431 = vmatpush1.bf16.msra.mxu1 %v2690_v34  ;;  %1510 = vmatprep.subr.bf16.mxu0 %v2764_v51  ;;  %v2743_v24 = vld [vmem:[#allocation8 + $0x284] ss:$16 sps:$4 sm:$0xff]   ;;  %v2804_v26 = vld [vmem:[#allocation8 + $0x5c0] ss:$16 sps:$4 sm:$0xff]  }
  0x82   :  { %1432 = vmatprep.subr.bf16.mxu1 %v2695_v36  ;;  %v2812_v27 = vld [vmem:[#allocation8 + $0x5e4] ss:$16 sps:$4 sm:$0xff]   ;;  %v2747_v29 = vld [vmem:[#allocation8 + $0x2a0] ss:$16 sps:$4 sm:$0xff]   ;;  %v2819_v36 = vld [vmem:[#allocation8 + $0x208] ss:$16 sps:$4 sm:$0xff]  }
  0x83   :  { %v2749_v28 = vld [vmem:[#allocation8 + $0x2a4] ss:$16 sps:$4 sm:$0xff]   ;;  %v2810_v30 = vld [vmem:[#allocation8 + $0x5e0] ss:$16 sps:$4 sm:$0xff]  }
  0x84   :  { %1511 = vmatpush1.bf16.msra.mxu0 %v2762_v53  ;;  %v103_v31 = vld [vmem:[#allocation3 + $0x20] sm:$0xff]  ;;  %v2851_v53 = vld [vmem:[#allocation8 + $0x2ac] ss:$16 sps:$4 sm:$0xff]  }
  0x85   :  { %1433 = vmatpush1.bf16.msra.mxu1 %v2693_v38  ;;  %1512 = vmatprep.subr.bf16.mxu0 %v2770_v55  ;;  %v2755_v33 = vld [vmem:[#allocation8 + $0x2c4] ss:$16 sps:$4 sm:$0xff]   ;;  %v3347_v34 = vpack.c.bf16 %v103_v31, %v103_v31  ;;  %v2753_v35 = vld [vmem:[#allocation8 + $0x2c0] ss:$16 sps:$4 sm:$0xff]   ;;  %v2905_v31 = vld [vmem:[#allocation8 + $0x3cc] ss:$16 sps:$4 sm:$0xff]  }
  0x86   :  { %1434 = vmatprep.subr.bf16.mxu1 %v2698_v40  ;;  %v2761_v38 = vld [vmem:[#allocation8 + $0x2e4] ss:$16 sps:$4 sm:$0xff]   ;;  %v2759_v39 = vld [vmem:[#allocation8 + $0x2e0] ss:$16 sps:$4 sm:$0xff]   ;;  %v2825_v40 = vld [vmem:[#allocation8 + $0x228] ss:$16 sps:$4 sm:$0xff]  }
  0x87   :  { %v2765_v43 = vld [vmem:[#allocation8 + $0x300] ss:$16 sps:$4 sm:$0xff]   ;;  %v2809_v8 = vld [vmem:[#allocation8 + $0x3e4] ss:$16 sps:$4 sm:$0xff]  }
  0x88   :  { %1513 = vmatpush1.bf16.msra.mxu0 %v2768_v57  ;;  %v2771_v47 = vld [vmem:[#allocation8 + $0x320] ss:$16 sps:$4 sm:$0xff]   ;;  %v2857_v57 = vld [vmem:[#allocation8 + $0x2cc] ss:$16 sps:$4 sm:$0xff]  }
  0x89   :  { %1435 = vmatpush1.bf16.msra.mxu1 %v2696_v42  ;;  %1514 = vmatprep.subr.bf16.mxu0 %v2776_v59  ;;  %v2767_v42 = vld [vmem:[#allocation8 + $0x304] ss:$16 sps:$4 sm:$0xff]   ;;  %v2777_v51 = vld [vmem:[#allocation8 + $0x340] ss:$16 sps:$4 sm:$0xff]  }
  0x8a   :  { %1436 = vmatprep.subr.bf16.mxu1 %v2701_v44  ;;  %v2831_v44 = vld [vmem:[#allocation8 + $0x248] ss:$16 sps:$4 sm:$0xff]   ;;  %v2783_v55 = vld [vmem:[#allocation8 + $0x360] ss:$16 sps:$4 sm:$0xff]  }
  0x8b   :  { %v2789_v59 = vld [vmem:[#allocation8 + $0x380] ss:$16 sps:$4 sm:$0xff]  }
  0x8c   :  { %1515 = vmatpush1.bf16.msra.mxu0 %v2774_v62  ;;  %v2797_v62 = vld [vmem:[#allocation8 + $0x3a4] ss:$16 sps:$4 sm:$0xff]   ;;  %v2795_v63 = vld [vmem:[#allocation8 + $0x3a0] ss:$16 sps:$4 sm:$0xff]  }
  0x8d   :  { %1437 = vmatpush1.bf16.msra.mxu1 %v2699_v46  ;;  %1516 = vmatprep.subr.bf16.mxu0 %v2782_v1  ;;  %v2773_v46 = vld [vmem:[#allocation8 + $0x324] ss:$16 sps:$4 sm:$0xff]   ;;  %v2861_v1 = vld [vmem:[#allocation8 + $0x2e8] ss:$16 sps:$4 sm:$0xff]   ;;  %v2801_v5 = vld [vmem:[#allocation8 + $0x3c0] ss:$16 sps:$4 sm:$0xff]  }
  0x8e   :  { %1438 = vmatprep.subr.bf16.mxu1 %v2704_v48  ;;  %v2837_v48 = vld [vmem:[#allocation8 + $0x268] ss:$16 sps:$4 sm:$0xff]  }
  0x90   :  { %1517 = vmatpush1.bf16.msra.mxu0 %v2780_v4  ;;  %v2803_v4 = vld [vmem:[#allocation8 + $0x3c4] ss:$16 sps:$4 sm:$0xff]  }
  0x91   :  { %1439 = vmatpush1.bf16.msra.mxu1 %v2702_v50  ;;  %1518 = vmatprep.subr.bf16.mxu0 %v2788_v7  ;;  %v2779_v50 = vld [vmem:[#allocation8 + $0x344] ss:$16 sps:$4 sm:$0xff]   ;;  %v2875_v7 = vld [vmem:[#allocation8 + $0x32c] ss:$16 sps:$4 sm:$0xff]  }
  0x92   :  { %1440 = vmatprep.subr.bf16.mxu1 %v2707_v52  ;;  %v2843_v52 = vld [vmem:[#allocation8 + $0x288] ss:$16 sps:$4 sm:$0xff]  }
  0x94   :  { %1519 = vmatpush1.bf16.msra.mxu0 %v2786_v13  ;;  %v2881_v13 = vld [vmem:[#allocation8 + $0x34c] ss:$16 sps:$4 sm:$0xff]  }
  0x95   :  { %1441 = vmatpush1.bf16.msra.mxu1 %v2705_v54  ;;  %1520 = vmatprep.subr.bf16.mxu0 %v2794_v14  ;;  %v2785_v54 = vld [vmem:[#allocation8 + $0x364] ss:$16 sps:$4 sm:$0xff]  }
  0x96   :  { %1442 = vmatprep.subr.bf16.mxu1 %v2710_v56  ;;  %v2849_v56 = vld [vmem:[#allocation8 + $0x2a8] ss:$16 sps:$4 sm:$0xff]   ;;  %v2815_v14 = vld [vmem:[#allocation8 + $0x604] ss:$16 sps:$4 sm:$0xff]  }
  0x98   :  { %1521 = vmatpush1.bf16.msra.mxu0 %v2792_v17  ;;  %v2879_v17 = vld [vmem:[#allocation8 + $0x348] ss:$16 sps:$4 sm:$0xff]  }
  0x99   :  { %1443 = vmatpush1.bf16.msra.mxu1 %v2708_v58  ;;  %1522 = vmatprep.subr.bf16.mxu0 %v2800_v18  ;;  %v2791_v58 = vld [vmem:[#allocation8 + $0x384] ss:$16 sps:$4 sm:$0xff]   ;;  %v2818_v18 = vld [vmem:[#allocation8 + $0xc] ss:$16 sps:$4 sm:$0xff]  }
  0x9a   :  { %1444 = vmatprep.subr.bf16.mxu1 %v2715_v60  ;;  %v2855_v60 = vld [vmem:[#allocation8 + $0x2c8] ss:$16 sps:$4 sm:$0xff]  }
  0x9c   :  { %1523 = vmatpush1.bf16.msra.mxu0 %v2798_v21  ;;  %v105_v21 = vld [vmem:[#allocation3 + $0x30] sm:$0xff] }
  0x9d   :  { %1445 = vmatpush1.bf16.msra.mxu1 %v2713_v61  ;;  %1524 = vmatprep.subr.bf16.mxu0 %v2806_v23  ;;  %v2863_v61 = vld [vmem:[#allocation8 + $0x2ec] ss:$16 sps:$4 sm:$0xff]  }
  0x9e   :  { %1455 = vmatprep.subr.bf16.mxu1 %v2719_v2  ;;  %v2869_v2 = vld [vmem:[#allocation8 + $0x30c] ss:$16 sps:$4 sm:$0xff]  }
  0x9f   :  { %v2893_v23 = vld [vmem:[#allocation8 + $0x38c] ss:$16 sps:$4 sm:$0xff]  }
  0xa0   :  { %1447 = vmatmul.mubr.bf16.vlgmr.msra.gmra.mrb[4].mxu1 %v3341_v3  ;;  %1525 = vmatpush1.bf16.msra.mxu0 %v2804_v26  ;;  %v2899_v26 = vld [vmem:[#allocation8 + $0x3ac] ss:$16 sps:$4 sm:$0xff]  }
  0xa1   :  { %1456 = vmatpush1.bf16.msra.mxu1 %v2717_v6  ;;  %1487 = vmatprep.mubr.bf16.mxu1 %v109_v10  ;;  %v2867_v6 = vld [vmem:[#allocation8 + $0x308] ss:$16 sps:$4 sm:$0xff]  }
  0xa2   :  { %1457 = vmatprep.subr.bf16.mxu1 %v2725_v9  ;;  %1526 = vmatprep.subr.bf16.mxu0 %v2812_v27  ;;  %v2807_v9 = vld [vmem:[#allocation8 + $0x3e0] ss:$16 sps:$4 sm:$0xff]   ;;  %v112_v27 = vpack.c.bf16 %v105_v21, %v105_v21 }
  0xa3   :  { %v2990_v21 = vld [vmem:[#allocation11 + $0x90] ss:$8 sps:$4 sm:$0xff]  }
  0xa4   :  { %1527 = vmatpush1.bf16.msra.mxu0 %v2810_v30  ;;  %v2822_v30 = vld [vmem:[#allocation8 + $0x28] ss:$16 sps:$4 sm:$0xff]  }
  0xa5   :  { %1458 = vmatpush1.bf16.msra.mxu1 %v2723_v12  ;;  %1619 = vmatprep.subr.bf16.mxu0 %v2821_v32  ;;  %v2873_v12 = vld [vmem:[#allocation8 + $0x328] ss:$16 sps:$4 sm:$0xff]   ;;  %v2830_v32 = vld [vmem:[#allocation8 + $0x4c] ss:$16 sps:$4 sm:$0xff]  }
  0xa6   :  { %1459 = vmatprep.subr.bf16.mxu1 %v2731_v15 }
  0xa7   :  { %1529 = vmatmul.mubr.bf16.vlgmr.msra.gmra.mrb[4].mxu0 %v3347_v34 }
  0xa8   :  { %1620 = vmatpush1.bf16.msra.mxu0 %v2819_v36  ;;  %1651 = vmatprep.mubr.bf16.mxu0 %v109_v10  ;;  %v101_v10 = vld [vmem:[#allocation3 + $0x10] sm:$0xff]  ;;  %v2911_v36 = vld [vmem:[#allocation8 + $0x3ec] ss:$16 sps:$4 sm:$0xff]  }
  0xa9   :  { %1460 = vmatpush1.bf16.msra.mxu1 %v2729_v16  ;;  %1621 = vmatprep.subr.bf16.mxu0 %v2827_v37  ;;  %v108_v15 = vpack.c.bf16 %v101_v10, %v101_v10  ;;  %v2813_v16 = vld [vmem:[#allocation8 + $0x600] ss:$16 sps:$4 sm:$0xff]   ;;  %v2836_v37 = vld [vmem:[#allocation8 + $0x6c] ss:$16 sps:$4 sm:$0xff]  }
  0xaa   :  { %1461 = vmatprep.subr.bf16.mxu1 %v2737_v19  ;;  %v2885_v19 = vld [vmem:[#allocation8 + $0x368] ss:$16 sps:$4 sm:$0xff]   ;;  %v2986_v10 = vld [vmem:[#allocation11 + $0x74] ss:$8 sps:$4 sm:$0xff]  }
  0xac   :  { %1622 = vmatpush1.bf16.msra.mxu0 %v2825_v40  ;;  %v2959_v40 = vld [vmem:[#allocation8 + $0x60c] ss:$16 sps:$4 sm:$0xff]  }
  0xad   :  { %1462 = vmatpush1.bf16.msra.mxu1 %v2735_v20  ;;  %1623 = vmatprep.subr.bf16.mxu0 %v2833_v41  ;;  %v2887_v20 = vld [vmem:[#allocation8 + $0x36c] ss:$16 sps:$4 sm:$0xff]  }
  0xae   :  { %1463 = vmatprep.subr.bf16.mxu1 %v2743_v24  ;;  %v2891_v24 = vld [vmem:[#allocation8 + $0x388] ss:$16 sps:$4 sm:$0xff]   ;;  %v2842_v41 = vld [vmem:[#allocation8 + $0x8c] ss:$16 sps:$4 sm:$0xff]  }
  0xb0   :  { %1624 = vmatpush1.bf16.msra.mxu0 %v2831_v44  ;;  %v2965_v44 = vld [vmem:[#allocation11 + $0x4] ss:$8 sps:$4 sm:$0xff]  }
  0xb1   :  { %1464 = vmatpush1.bf16.msra.mxu1 %v2741_v25  ;;  %1625 = vmatprep.subr.bf16.mxu0 %v2839_v45  ;;  %v2816_v25 = vld [vmem:[#allocation8 + $0x8] ss:$16 sps:$4 sm:$0xff]  }
  0xb2   :  { %1465 = vmatprep.subr.bf16.mxu1 %v2749_v28  ;;  %v2824_v28 = vld [vmem:[#allocation8 + $0x2c] ss:$16 sps:$4 sm:$0xff]   ;;  %v2846_v45 = vld [vmem:[#allocation8 + $0xa8] ss:$16 sps:$4 sm:$0xff]  }
  0xb4   :  { %1626 = vmatpush1.bf16.msra.mxu0 %v2837_v48  ;;  %v2852_v48 = vld [vmem:[#allocation8 + $0xc8] ss:$16 sps:$4 sm:$0xff]  }
  0xb5   :  { %1466 = vmatpush1.bf16.msra.mxu1 %v2747_v29  ;;  %1627 = vmatprep.subr.bf16.mxu0 %v2845_v49  ;;  %v2897_v29 = vld [vmem:[#allocation8 + $0x3a8] ss:$16 sps:$4 sm:$0xff]   ;;  %v2968_v49 = vld [vmem:[#allocation11 + $0x14] ss:$8 sps:$4 sm:$0xff]  }
  0xb6   :  { %1467 = vmatprep.subr.bf16.mxu1 %v2755_v33  ;;  %v2903_v33 = vld [vmem:[#allocation8 + $0x3c8] ss:$16 sps:$4 sm:$0xff]  }
  0xb8   :  { %1628 = vmatpush1.bf16.msra.mxu0 %v2843_v52  ;;  %v2858_v52 = vld [vmem:[#allocation8 + $0xe8] ss:$16 sps:$4 sm:$0xff]  }
  0xb9   :  { %1468 = vmatpush1.bf16.msra.mxu1 %v2753_v35  ;;  %1629 = vmatprep.subr.bf16.mxu0 %v2851_v53  ;;  %v2828_v35 = vld [vmem:[#allocation8 + $0x48] ss:$16 sps:$4 sm:$0xff]   ;;  %v2971_v53 = vld [vmem:[#allocation11 + $0x24] ss:$8 sps:$4 sm:$0xff]  }
  0xba   :  { %1469 = vmatprep.subr.bf16.mxu1 %v2761_v38  ;;  %v2909_v38 = vld [vmem:[#allocation8 + $0x3e8] ss:$16 sps:$4 sm:$0xff]  }
  0xbc   :  { %1630 = vmatpush1.bf16.msra.mxu0 %v2849_v56  ;;  %v2974_v56 = vld [vmem:[#allocation11 + $0x34] ss:$8 sps:$4 sm:$0xff]  }
  0xbd   :  { %1470 = vmatpush1.bf16.msra.mxu1 %v2759_v39  ;;  %1631 = vmatprep.subr.bf16.mxu0 %v2857_v57  ;;  %v2834_v39 = vld [vmem:[#allocation8 + $0x68] ss:$16 sps:$4 sm:$0xff]   ;;  %v2872_v57 = vld [vmem:[#allocation8 + $0x12c] ss:$16 sps:$4 sm:$0xff]  }
  0xbe   :  { %1471 = vmatprep.subr.bf16.mxu1 %v2767_v42  ;;  %v2957_v42 = vld [vmem:[#allocation8 + $0x608] ss:$16 sps:$4 sm:$0xff]  }
  0xc0   :  { %1632 = vmatpush1.bf16.msra.mxu0 %v2855_v60  ;;  %v2977_v60 = vld [vmem:[#allocation11 + $0x44] ss:$8 sps:$4 sm:$0xff]  }
  0xc1   :  { %1472 = vmatpush1.bf16.msra.mxu1 %v2765_v43  ;;  %1633 = vmatprep.subr.bf16.mxu0 %v2863_v61  ;;  %v2840_v43 = vld [vmem:[#allocation8 + $0x88] ss:$16 sps:$4 sm:$0xff]   ;;  %v2878_v61 = vld [vmem:[#allocation8 + $0x14c] ss:$16 sps:$4 sm:$0xff]  }
  0xc2   :  { %1473 = vmatprep.subr.bf16.mxu1 %v2773_v46  ;;  %v2854_v46 = vld [vmem:[#allocation8 + $0xcc] ss:$16 sps:$4 sm:$0xff]  }
  0xc4   :  { %1634 = vmatpush1.bf16.msra.mxu0 %v2861_v1  ;;  %v2980_v1 = vld [vmem:[#allocation11 + $0x54] ss:$8 sps:$4 sm:$0xff]  }
  0xc5   :  { %1474 = vmatpush1.bf16.msra.mxu1 %v2771_v47  ;;  %1635 = vmatprep.subr.bf16.mxu0 %v2869_v2  ;;  %v2963_v47 = vld [vmem:[#allocation11] ss:$8 sps:$4 sm:$0xff]   ;;  %v2884_v2 = vld [vmem:[#allocation8 + $0x16c] ss:$16 sps:$4 sm:$0xff]  }
  0xc6   :  { %1475 = vmatprep.subr.bf16.mxu1 %v2779_v50  ;;  %v2860_v50 = vld [vmem:[#allocation8 + $0xec] ss:$16 sps:$4 sm:$0xff]  }
  0xc8   :  { %1636 = vmatpush1.bf16.msra.mxu0 %v2867_v6  ;;  %v2983_v6 = vld [vmem:[#allocation11 + $0x64] ss:$8 sps:$4 sm:$0xff]  }
  0xc9   :  { %1476 = vmatpush1.bf16.msra.mxu1 %v2777_v51  ;;  %1637 = vmatprep.subr.bf16.mxu0 %v2875_v7  ;;  %v2966_v51 = vld [vmem:[#allocation11 + $0x10] ss:$8 sps:$4 sm:$0xff]   ;;  %v2890_v7 = vld [vmem:[#allocation8 + $0x18c] ss:$16 sps:$4 sm:$0xff]  }
  0xca   :  { %1477 = vmatprep.subr.bf16.mxu1 %v2785_v54  ;;  %v2969_v54 = vld [vmem:[#allocation11 + $0x20] ss:$8 sps:$4 sm:$0xff]  }
  0xcc   :  { %1638 = vmatpush1.bf16.msra.mxu0 %v2873_v12  ;;  %v2896_v12 = vld [vmem:[#allocation8 + $0x1ac] ss:$16 sps:$4 sm:$0xff]  }
  0xcd   :  { %1478 = vmatpush1.bf16.msra.mxu1 %v2783_v55  ;;  %1639 = vmatprep.subr.bf16.mxu0 %v2881_v13  ;;  %v2864_v55 = vld [vmem:[#allocation8 + $0x108] ss:$16 sps:$4 sm:$0xff]  }
  0xce   :  { %1479 = vmatprep.subr.bf16.mxu1 %v2791_v58  ;;  %v2972_v58 = vld [vmem:[#allocation11 + $0x30] ss:$8 sps:$4 sm:$0xff]  }
  0xcf   :  { %v2984_v13 = vld [vmem:[#allocation11 + $0x70] ss:$8 sps:$4 sm:$0xff]  }
  0xd0   :  { %1640 = vmatpush1.bf16.msra.mxu0 %v2879_v17  ;;  %v2987_v17 = vld [vmem:[#allocation11 + $0x80] ss:$8 sps:$4 sm:$0xff]  }
  0xd1   :  { %1480 = vmatpush1.bf16.msra.mxu1 %v2789_v59  ;;  %1641 = vmatprep.subr.bf16.mxu0 %v2887_v20  ;;  %v2870_v59 = vld [vmem:[#allocation8 + $0x128] ss:$16 sps:$4 sm:$0xff]   ;;  %v2908_v20 = vld [vmem:[#allocation8 + $0x1ec] ss:$16 sps:$4 sm:$0xff]  }
  0xd2   :  { %1481 = vmatprep.subr.bf16.mxu1 %v2797_v62  ;;  %v2975_v62 = vld [vmem:[#allocation11 + $0x40] ss:$8 sps:$4 sm:$0xff]  }
  0xd4   :  { %1642 = vmatpush1.bf16.msra.mxu0 %v2885_v19  ;;  %v2992_v19 = vld [vmem:[#allocation11 + $0x94] ss:$8 sps:$4 sm:$0xff]  }
  0xd5   :  { %1482 = vmatpush1.bf16.msra.mxu1 %v2795_v63  ;;  %1643 = vmatprep.subr.bf16.mxu0 %v2893_v23  ;;  %v2876_v63 = vld [vmem:[#allocation8 + $0x148] ss:$16 sps:$4 sm:$0xff]  }
  0xd6   :  { %1483 = vmatprep.subr.bf16.mxu1 %v2803_v4  ;;  %v2978_v4 = vld [vmem:[#allocation11 + $0x50] ss:$8 sps:$4 sm:$0xff]  }
  0xd7   :  { %v2906_v23 = vld [vmem:[#allocation8 + $0x1e8] ss:$16 sps:$4 sm:$0xff]  }
  0xd8   :  { %1644 = vmatpush1.bf16.msra.mxu0 %v2891_v24  ;;  %v2995_v24 = vld [vmem:[#allocation11 + $0xa4] ss:$8 sps:$4 sm:$0xff]  }
  0xd9   :  { %1484 = vmatpush1.bf16.msra.mxu1 %v2801_v5  ;;  %1645 = vmatprep.subr.bf16.mxu0 %v2899_v26  ;;  %v2882_v5 = vld [vmem:[#allocation8 + $0x168] ss:$16 sps:$4 sm:$0xff]  }
  0xda   :  { %1485 = vmatprep.subr.bf16.mxu1 %v2809_v8  ;;  %v2981_v8 = vld [vmem:[#allocation11 + $0x60] ss:$8 sps:$4 sm:$0xff]  }
  0xdb   :  { %v2993_v26 = vld [vmem:[#allocation11 + $0xa0] ss:$8 sps:$4 sm:$0xff]  }
  0xdc   :  { %1646 = vmatpush1.bf16.msra.mxu0 %v2897_v29  ;;  %v2915_v29 = vld [vmem:[#allocation8 + $0x428] ss:$16 sps:$4 sm:$0xff]  }
  0xdd   :  { %1486 = vmatpush1.bf16.msra.mxu1 %v2807_v9  ;;  %1647 = vmatprep.subr.bf16.mxu0 %v2905_v31  ;;  %v2888_v9 = vld [vmem:[#allocation8 + $0x188] ss:$16 sps:$4 sm:$0xff]  }
  0xde   :  { %1537 = vmatprep.subr.bf16.mxu1 %v2815_v14  ;;  %v2894_v14 = vld [vmem:[#allocation8 + $0x1a8] ss:$16 sps:$4 sm:$0xff]  }
  0xdf   :  { %v2918_v31 = vld [vmem:[#allocation8 + $0x448] ss:$16 sps:$4 sm:$0xff]  }
  0xe0   :  { %1488 = vmatmul.mubr.bf16.vlgmr.msra.gmra.mrb[8].mxu1 %v108_v15  ;;  %1648 = vmatpush1.bf16.msra.mxu0 %v2903_v33  ;;  %v2921_v33 = vld [vmem:[#allocation8 + $0x468] ss:$16 sps:$4 sm:$0xff]  }
  0xe1   :  { %1538 = vmatpush1.bf16.msra.mxu1 %v2813_v16  ;;  %1569 = vmatprep.mubr.bf16.mxu1 %v3212_v0  ;;  %v2902_v16 = vld [vmem:[#allocation8 + $0x1cc] ss:$16 sps:$4 sm:$0xff]  }
  0xe2   :  { %1578 = vmatprep.subr.bf16.mxu1 %v2818_v18  ;;  %1649 = vmatprep.subr.bf16.mxu0 %v2911_v36  ;;  %v2900_v18 = vld [vmem:[#allocation8 + $0x1c8] ss:$16 sps:$4 sm:$0xff]   ;;  %v2998_v36 = vld [vmem:[#allocation11 + $0xb4] ss:$8 sps:$4 sm:$0xff]  }
  0xe4   :  { %1650 = vmatpush1.bf16.msra.mxu0 %v2909_v38  ;;  %v2996_v38 = vld [vmem:[#allocation11 + $0xb0] ss:$8 sps:$4 sm:$0xff]  }
  0xe5   :  { %1701 = vmatprep.subr.bf16.mxu0 %v2959_v40 }
  0xe7   :  { %1652 = vmatmul.mubr.bf16.vlgmr.msra.gmra.mrb[8].mxu0 %v108_v15  ;;  %v2989_v15 = vld [vmem:[#allocation11 + $0x84] ss:$8 sps:$4 sm:$0xff]  }
  0xe8   :  { %2580 = vmatmul.mubr.msk.bf16.vlgmr.msra.gmra.mrb[12].mxu1 %vm1410_vm2, %v112_v27  ;;  %1702 = vmatpush1.bf16.msra.mxu0 %v2957_v42  ;;  %v3001_v42 = vld [vmem:[#allocation11 + $0xc4] ss:$8 sps:$4 sm:$0xff]  }
  0xe9   :  { %1579 = vmatpush1.bf16.msra.mxu1 %v2816_v25  ;;  %1610 = vmatprep.mubr.bf16.mxu1 %v3336_v22  ;;  %v2848_v22 = vld [vmem:[#allocation8 + $0xac] ss:$16 sps:$4 sm:$0xff]  }
  0xea   :  { %1580 = vmatprep.subr.bf16.mxu1 %v2824_v28  ;;  %1733 = vmatprep.mubr.bf16.mxu0 %v3212_v0  ;;  %v2866_v0 = vld [vmem:[#allocation8 + $0x10c] ss:$16 sps:$4 sm:$0xff]  }
  0xeb   :  { %2180 = vmatprep.subr.bf16.mxu0 %v2965_v44  ;;  %v2914_v25 = vld [vmem:[#allocation8 + $0x40c] ss:$16 sps:$4 sm:$0xff]  }
  0xec   :  { %v2917_v28 = vld [vmem:[#allocation8 + $0x42c] ss:$16 sps:$4 sm:$0xff]  }
  0xed   :  { %1581 = vmatpush1.bf16.msra.mxu1 %v2822_v30  ;;  %v2920_v30 = vld [vmem:[#allocation8 + $0x44c] ss:$16 sps:$4 sm:$0xff]  }
  0xee   :  { %1582 = vmatprep.subr.bf16.mxu1 %v2830_v32  ;;  %v2923_v32 = vld [vmem:[#allocation8 + $0x46c] ss:$16 sps:$4 sm:$0xff]  }
  0xef   :  { %2581 = vmatmul.mubr.msk.bf16.vlgmr.msra.gmra.mrb[12].mxu0 %vm1410_vm2, %v112_v27  ;;  %v2912_v27 = vld [vmem:[#allocation8 + $0x408] ss:$16 sps:$4 sm:$0xff]   ;;  %v2932_v44 = vld [vmem:[#allocation8 + $0x4cc] ss:$16 sps:$4 sm:$0xff]  }
  0xf0   :  { %2181 = vmatpush1.bf16.msra.mxu0 %v2963_v47  ;;  %v2930_v47 = vld [vmem:[#allocation8 + $0x4c8] ss:$16 sps:$4 sm:$0xff]  }
  0xf1   :  { %1583 = vmatpush1.bf16.msra.mxu1 %v2828_v35  ;;  %2182 = vmatprep.subr.bf16.mxu0 %v2968_v49  ;;  %v2926_v35 = vld [vmem:[#allocation8 + $0x48c] ss:$16 sps:$4 sm:$0xff]  }
  0xf2   :  { %1584 = vmatprep.subr.bf16.mxu1 %v2836_v37  ;;  %v3007_v49 = vld [vmem:[#allocation11 + $0xe4] ss:$8 sps:$4 sm:$0xff]  }
  0xf4   :  { %2183 = vmatpush1.bf16.msra.mxu0 %v2966_v51  ;;  %v2933_v51 = vld [vmem:[#allocation8 + $0x4e8] ss:$16 sps:$4 sm:$0xff]  }
  0xf5   :  { %1585 = vmatpush1.bf16.msra.mxu1 %v2834_v39  ;;  %2184 = vmatprep.subr.bf16.mxu0 %v2971_v53  ;;  %v3010_v53 = vld [vmem:[#allocation11 + $0xf4] ss:$8 sps:$4 sm:$0xff]  }
  0xf6   :  { %1586 = vmatprep.subr.bf16.mxu1 %v2842_v41  ;;  %v2929_v41 = vld [vmem:[#allocation8 + $0x4ac] ss:$16 sps:$4 sm:$0xff]  }
  0xf8   :  { %2185 = vmatpush1.bf16.msra.mxu0 %v2969_v54  ;;  %v2936_v54 = vld [vmem:[#allocation8 + $0x508] ss:$16 sps:$4 sm:$0xff]  }
  0xf9   :  { %1587 = vmatpush1.bf16.msra.mxu1 %v2840_v43  ;;  %2186 = vmatprep.subr.bf16.mxu0 %v2974_v56  ;;  %v2999_v43 = vld [vmem:[#allocation11 + $0xc0] ss:$8 sps:$4 sm:$0xff]  }
  0xfa   :  { %1588 = vmatprep.subr.bf16.mxu1 %v2848_v22  ;;  %v2927_v22 = vld [vmem:[#allocation8 + $0x4a8] ss:$16 sps:$4 sm:$0xff]  }
  0xfb   :  { %v2939_v56 = vld [vmem:[#allocation8 + $0x528] ss:$16 sps:$4 sm:$0xff]  }
  0xfc   :  { %2187 = vmatpush1.bf16.msra.mxu0 %v2972_v58 }
  0xfd   :  { %1589 = vmatpush1.bf16.msra.mxu1 %v2846_v45  ;;  %2188 = vmatprep.subr.bf16.mxu0 %v2977_v60  ;;  %v3004_v45 = vld [vmem:[#allocation11 + $0xd4] ss:$8 sps:$4 sm:$0xff]  }
  0xfe   :  { %1590 = vmatprep.subr.bf16.mxu1 %v2854_v46  ;;  %v3002_v46 = vld [vmem:[#allocation11 + $0xd0] ss:$8 sps:$4 sm:$0xff]  }
 0x100   :  { %2189 = vmatpush1.bf16.msra.mxu0 %v2975_v62 }
 0x101   :  { %1591 = vmatpush1.bf16.msra.mxu1 %v2852_v48  ;;  %2190 = vmatprep.subr.bf16.mxu0 %v2980_v1  ;;  %v2935_v48 = vld [vmem:[#allocation8 + $0x4ec] ss:$16 sps:$4 sm:$0xff]   ;;  %v2945_v1 = vld [vmem:[#allocation8 + $0x568] ss:$16 sps:$4 sm:$0xff]  }
 0x102   :  { %1592 = vmatprep.subr.bf16.mxu1 %v2860_v50  ;;  %v3005_v50 = vld [vmem:[#allocation11 + $0xe0] ss:$8 sps:$4 sm:$0xff]  }
 0x104   :  { %2191 = vmatpush1.bf16.msra.mxu0 %v2978_v4  ;;  %v2948_v4 = vld [vmem:[#allocation8 + $0x588] ss:$16 sps:$4 sm:$0xff]  }
 0x105   :  { %1593 = vmatpush1.bf16.msra.mxu1 %v2858_v52  ;;  %2192 = vmatprep.subr.bf16.mxu0 %v2983_v6  ;;  %v2938_v52 = vld [vmem:[#allocation8 + $0x50c] ss:$16 sps:$4 sm:$0xff]   ;;  %v2951_v6 = vld [vmem:[#allocation8 + $0x5a8] ss:$16 sps:$4 sm:$0xff]  }
 0x106   :  { %1594 = vmatprep.subr.bf16.mxu1 %v2866_v0  ;;  %v3008_v0 = vld [vmem:[#allocation11 + $0xf0] ss:$8 sps:$4 sm:$0xff]  }
 0x108   :  { %2193 = vmatpush1.bf16.msra.mxu0 %v2981_v8  ;;  %v2954_v8 = vld [vmem:[#allocation8 + $0x5c8] ss:$16 sps:$4 sm:$0xff]  }
 0x109   :  { %1595 = vmatpush1.bf16.msra.mxu1 %v2864_v55  ;;  %2194 = vmatprep.subr.bf16.mxu0 %v2986_v10  ;;  %v2941_v55 = vld [vmem:[#allocation8 + $0x52c] ss:$16 sps:$4 sm:$0xff]   ;;  %v2960_v10 = vld [vmem:[#allocation8 + $0x5e8] ss:$16 sps:$4 sm:$0xff]  }
 0x10a   :  { %1596 = vmatprep.subr.bf16.mxu1 %v2872_v57  ;;  %v2944_v57 = vld [vmem:[#allocation8 + $0x54c] ss:$16 sps:$4 sm:$0xff]  }
 0x10c   :  { %2195 = vmatpush1.bf16.msra.mxu0 %v2984_v13 }
 0x10d   :  { %1597 = vmatpush1.bf16.msra.mxu1 %v2870_v59  ;;  %2196 = vmatprep.subr.bf16.mxu0 %v2989_v15 }
 0x10e   :  { %1598 = vmatprep.subr.bf16.mxu1 %v2878_v61  ;;  %v2942_v61 = vld [vmem:[#allocation8 + $0x548] ss:$16 sps:$4 sm:$0xff]  }
 0x110   :  { %2197 = vmatpush1.bf16.msra.mxu0 %v2987_v17 }
 0x111   :  { %1599 = vmatpush1.bf16.msra.mxu1 %v2876_v63  ;;  %2198 = vmatprep.subr.bf16.mxu0 %v2992_v19  ;;  %v2947_v63 = vld [vmem:[#allocation8 + $0x56c] ss:$16 sps:$4 sm:$0xff]  }
 0x112   :  { %1600 = vmatprep.subr.bf16.mxu1 %v2884_v2  ;;  %v2950_v2 = vld [vmem:[#allocation8 + $0x58c] ss:$16 sps:$4 sm:$0xff]  }
 0x114   :  { %2199 = vmatpush1.bf16.msra.mxu0 %v2990_v21 }
 0x115   :  { %1601 = vmatpush1.bf16.msra.mxu1 %v2882_v5  ;;  %2200 = vmatprep.subr.bf16.mxu0 %v2995_v24  ;;  %v2953_v5 = vld [vmem:[#allocation8 + $0x5ac] ss:$16 sps:$4 sm:$0xff]   ;;  %v1744_v24 = vlaneseq }
 0x116   :  { %1602 = vmatprep.subr.bf16.mxu1 %v2890_v7  ;;  %v2956_v7 = vld [vmem:[#allocation8 + $0x5cc] ss:$16 sps:$4 sm:$0xff]  }
 0x118   :  { %2201 = vmatpush1.bf16.msra.mxu0 %v2993_v26 }
 0x119   :  { %1603 = vmatpush1.bf16.msra.mxu1 %v2888_v9  ;;  %2202 = vmatprep.subr.bf16.mxu0 %v2998_v36  ;;  %v2962_v9 = vld [vmem:[#allocation8 + $0x5ec] ss:$16 sps:$4 sm:$0xff]  }
 0x11a   :  { %1604 = vmatprep.subr.bf16.mxu1 %v2896_v12 }
 0x11c   :  { %2203 = vmatpush1.bf16.msra.mxu0 %v2996_v38 }
 0x11d   :  { %1605 = vmatpush1.bf16.msra.mxu1 %v2894_v14  ;;  %2204 = vmatprep.subr.bf16.mxu0 %v3001_v42 }
 0x11e   :  { %1606 = vmatprep.subr.bf16.mxu1 %v2902_v16 }
 0x120   :  { %2205 = vmatpush1.bf16.msra.mxu0 %v2999_v43 }
 0x121   :  { %1607 = vmatpush1.bf16.msra.mxu1 %v2900_v18  ;;  %2206 = vmatprep.subr.bf16.mxu0 %v3004_v45  ;;  %v3013_v18 = vld [vmem:[#allocation11 + $0x104] ss:$8 sps:$4 sm:$0xff]  }
 0x122   :  { %1608 = vmatprep.subr.bf16.mxu1 %v2908_v20 }
 0x124   :  { %2207 = vmatpush1.bf16.msra.mxu0 %v3002_v46 }
 0x125   :  { %1609 = vmatpush1.bf16.msra.mxu1 %v2906_v23  ;;  %2208 = vmatprep.subr.bf16.mxu0 %v3007_v49 }
 0x126   :  { %1660 = vmatprep.subr.bf16.mxu1 %v2914_v25  ;;  %v3362_v25 = vshrl.u32 %v1744_v24, 7  ;;  %v3052_v24 = vld [vmem:[#allocation11 + $0x1d4] ss:$8 sps:$4 sm:$0xff]  }
 0x128   :  { %1611 = vmatmul.mubr.bf16.vlgmr.msra.gmra.mrb[16].mxu1 %v3341_v3  ;;  %2209 = vmatpush1.bf16.msra.mxu0 %v3005_v50  ;;  %v3373_v36 = vsub.s32 1, %v3362_v25 }
 0x129   :  { %1661 = vmatpush1.bf16.msra.mxu1 %v2912_v27  ;;  %1692 = vmatprep.mubr.bf16.mxu1 %v3343_v11  ;;  %v2924_v11 = vld [vmem:[#allocation8 + $0x488] ss:$16 sps:$4 sm:$0xff]  }
 0x12a   :  { %1662 = vmatprep.subr.bf16.mxu1 %v2917_v28  ;;  %2210 = vmatprep.subr.bf16.mxu0 %v3010_v53  ;;  %v3016_v53 = vld [vmem:[#allocation11 + $0x114] ss:$8 sps:$4 sm:$0xff]  }
 0x12c   :  { %2211 = vmatpush1.bf16.msra.mxu0 %v3008_v0  ;;  %v3014_v0 = vld [vmem:[#allocation11 + $0x110] ss:$8 sps:$4 sm:$0xff]  }
 0x12d   :  { %1663 = vmatpush1.bf16.msra.mxu1 %v2915_v29  ;;  %2221 = vmatprep.subr.bf16.mxu0 %v3013_v18  ;;  %v3041_v18 = vld [vmem:[#allocation11 + $0x1a0] ss:$8 sps:$4 sm:$0xff]  }
 0x12e   :  { %1664 = vmatprep.subr.bf16.mxu1 %v2920_v30 }
 0x131   :  { %1665 = vmatpush1.bf16.msra.mxu1 %v2918_v31 }
 0x132   :  { %1666 = vmatprep.subr.bf16.mxu1 %v2923_v32  ;;  %v3365_v32 = vsub.s32 0, %v3362_v25 }
 0x133   :  { %v3357_v37 = vpop.f32.mrb[0].mxu1 }
 0x134   :  { %v3359_v3 = vpop.f32.mrb[1].mxu1 }
 0x135   :  { %1667 = vmatpush1.bf16.msra.mxu1 %v2921_v33  ;;  %v427_v39 = vpop.f32.mrb[2].mxu1 }
 0x136   :  { %v428_v40 = vpop.f32.mrb[3].mxu1  ;;  %1668 = vmatprep.subr.bf16.mxu1 %v2926_v35  ;;  %v3370_v35 = vld [vmem:[%s3426_s4] sm:$0xf] }
 0x137   :  { %v1747_v38 = vrot.slane %v3370_v35, %v3365_v32 }
 0x139   :  { %1669 = vmatpush1.bf16.msra.mxu1 %v2924_v11  ;;  %v1751_v11 = vrot.slane %v3370_v35, %v3373_v36 }
 0x13a   :  { %1670 = vmatprep.subr.bf16.mxu1 %v2929_v41  ;;  %v382_v58 = vpop.f32.mrb[0].mxu0 }
 0x13b   :  { %v384_v59 = vpop.f32.mrb[1].mxu0 }
 0x13c   :  { %v386_v60 = vpop.f32.mrb[2].mxu0 }
 0x13d   :  { %1671 = vmatpush1.bf16.msra.mxu1 %v2927_v22  ;;  %v387_v62 = vpop.f32.mrb[3].mxu0 }
 0x13e   :  { %1672 = vmatprep.subr.bf16.mxu1 %v2932_v44  ;;  %v3025_v62 = vld [vmem:[#allocation11 + $0x144] ss:$8 sps:$4 sm:$0xff]  }
 0x141   :  { %1673 = vmatpush1.bf16.msra.mxu1 %v2930_v47 }
 0x142   :  { %1674 = vmatprep.subr.bf16.mxu1 %v2935_v48 }
 0x145   :  { %1675 = vmatpush1.bf16.msra.mxu1 %v2933_v51  ;;  %v3011_v51 = vld [vmem:[#allocation11 + $0x100] ss:$8 sps:$4 sm:$0xff]  }
 0x146   :  { %1676 = vmatprep.subr.bf16.mxu1 %v2938_v52 }
 0x149   :  { %1677 = vmatpush1.bf16.msra.mxu1 %v2936_v54  ;;  %v3019_v54 = vld [vmem:[#allocation11 + $0x124] ss:$8 sps:$4 sm:$0xff]  }
 0x14a   :  { %1678 = vmatprep.subr.bf16.mxu1 %v2941_v55 }
 0x14d   :  { %1679 = vmatpush1.bf16.msra.mxu1 %v2939_v56 }
 0x14e   :  { %1680 = vmatprep.subr.bf16.mxu1 %v2944_v57  ;;  %v3017_v57 = vld [vmem:[#allocation11 + $0x120] ss:$8 sps:$4 sm:$0xff]  }
 0x151   :  { %1681 = vmatpush1.bf16.msra.mxu1 %v2942_v61  ;;  %v3020_v61 = vld [vmem:[#allocation11 + $0x130] ss:$8 sps:$4 sm:$0xff]  }
 0x152   :  { %1682 = vmatprep.subr.bf16.mxu1 %v2947_v63 }
 0x155   :  { %1683 = vmatpush1.bf16.msra.mxu1 %v2945_v1 }
 0x156   :  { %1684 = vmatprep.subr.bf16.mxu1 %v2950_v2  ;;  %v3023_v2 = vld [vmem:[#allocation11 + $0x140] ss:$8 sps:$4 sm:$0xff]  }
 0x159   :  { %1685 = vmatpush1.bf16.msra.mxu1 %v2948_v4 }
 0x15a   :  { %1686 = vmatprep.subr.bf16.mxu1 %v2953_v5  ;;  %v3028_v5 = vld [vmem:[#allocation11 + $0x154] ss:$8 sps:$4 sm:$0xff]  }
 0x15d   :  { %1687 = vmatpush1.bf16.msra.mxu1 %v2951_v6 }
 0x15e   :  { %1688 = vmatprep.subr.bf16.mxu1 %v2956_v7  ;;  %v3026_v7 = vld [vmem:[#allocation11 + $0x150] ss:$8 sps:$4 sm:$0xff]  }
 0x161   :  { %1689 = vmatpush1.bf16.msra.mxu1 %v2954_v8  ;;  %v3031_v8 = vld [vmem:[#allocation11 + $0x164] ss:$8 sps:$4 sm:$0xff]  }
 0x162   :  { %1690 = vmatprep.subr.bf16.mxu1 %v2962_v9  ;;  %v3029_v9 = vld [vmem:[#allocation11 + $0x160] ss:$8 sps:$4 sm:$0xff]  }
 0x165   :  { %1691 = vmatpush1.bf16.msra.mxu1 %v2960_v10  ;;  %v3034_v10 = vld [vmem:[#allocation11 + $0x174] ss:$8 sps:$4 sm:$0xff]  }
 0x168   :  { %1693 = vmatmul.mubr.bf16.vlgmr.msra.gmra.mrb[20].mxu1 %v3347_v34 }
 0x173   :  { %v1448_v12 = vpop.f32.mrb[4].mxu1 }
 0x174   :  { %v1449_v13 = vadd.f32 %v1448_v12, %v382_v58  ;;  %v1450_v14 = vpop.f32.mrb[5].mxu1  ;;  %v3032_v12 = vld [vmem:[#allocation11 + $0x170] ss:$8 sps:$4 sm:$0xff]  }
 0x175   :  { %v1451_v15 = vadd.f32 %v1450_v14, %v384_v59  ;;  %v1452_v16 = vpop.f32.mrb[6].mxu1  ;;  %v3022_v59 = vld [vmem:[#allocation11 + $0x134] ss:$8 sps:$4 sm:$0xff]   ;;  %v3035_v14 = vld [vmem:[#allocation11 + $0x180] ss:$8 sps:$4 sm:$0xff]  }
 0x176   :  { %v1453_v17 = vpop.f32.mrb[7].mxu1  ;;  %v3038_v16 = vld [vmem:[#allocation11 + $0x190] ss:$8 sps:$4 sm:$0xff]  }
 0x177   :  { %v3043_v17 = vld [vmem:[#allocation11 + $0x1a4] ss:$8 sps:$4 sm:$0xff]  }
 0x17a   :  { %v1530_v19 = vpop.f32.mrb[4].mxu0 }
 0x17b   :  { %v1532_v20 = vpop.f32.mrb[5].mxu0 }
 0x17c   :  { %v1534_v21 = vpop.f32.mrb[6].mxu0 }
 0x17d   :  { %v1535_v23 = vpop.f32.mrb[7].mxu0  ;;  %v3049_v21 = vld [vmem:[#allocation11 + $0x1c4] ss:$8 sps:$4 sm:$0xff]  }
 0x17e   :  { %v3047_v23 = vld [vmem:[#allocation11 + $0x1c0] ss:$8 sps:$4 sm:$0xff]  }
 0x1b3   :  { %v1489_v26 = vpop.f32.mrb[8].mxu1 }
 0x1b4   :  { %v1490_v27 = vadd.f32 %v1489_v26, %v1449_v13  ;;  %v1491_v28 = vpop.f32.mrb[9].mxu1  ;;  %v3037_v13 = vld [vmem:[#allocation11 + $0x184] ss:$8 sps:$4 sm:$0xff]   ;;  %v3050_v26 = vld [vmem:[#allocation11 + $0x1d0] ss:$8 sps:$4 sm:$0xff]  }
 0x1b5   :  { %v1492_v29 = vadd.f32 %v1491_v28, %v1451_v15  ;;  %v1493_v34 = vpop.f32.mrb[10].mxu1  ;;  %v3040_v15 = vld [vmem:[#allocation11 + $0x194] ss:$8 sps:$4 sm:$0xff]  }
 0x1b6   :  { %v1531_v30 = vadd.f32 %v1530_v19, %v1490_v27  ;;  %v1494_v31 = vpop.f32.mrb[11].mxu1  ;;  %v3046_v19 = vld [vmem:[#allocation11 + $0x1b4] ss:$8 sps:$4 sm:$0xff]   ;;  %v3055_v27 = vld [vmem:[#allocation11 + $0x1e4] ss:$8 sps:$4 sm:$0xff]  }
 0x1b7   :  { %v1533_v33 = vadd.f32 %v1532_v20, %v1492_v29  ;;  %v3044_v20 = vld [vmem:[#allocation11 + $0x1b0] ss:$8 sps:$4 sm:$0xff]  }
 0x1ba   :  { %v3379_v55 = vpop.f32.mrb[8].mxu0 }
 0x1bb   :  { %v1571_v39 = vpop.f32.mrb[12].mxu1  ;;  %v3381_v56 = vpop.f32.mrb[9].mxu0 }
 0x1bc   :  { %v1572_v40 = vadd.f32 %v1571_v39, %v1531_v30  ;;  %v1573_v41 = vpop.f32.mrb[13].mxu1  ;;  %v1657_v58 = vpop.f32.mrb[10].mxu0  ;;  %v3053_v30 = vld [vmem:[#allocation11 + $0x1e0] ss:$8 sps:$4 sm:$0xff]  }
 0x1bd   :  { %v1574_v42 = vadd.f32 %v1573_v41, %v1533_v33  ;;  %v1575_v43 = vpop.f32.mrb[14].mxu1  ;;  %v1658_v60 = vpop.f32.mrb[11].mxu0  ;;  %v3056_v41 = vld [vmem:[#allocation11 + $0x1f0] ss:$8 sps:$4 sm:$0xff]   ;;  %v1848_v58 = vld [vmem:[%s3428_s6] sm:$0x3] }
 0x1be   :  { %v1764_v22 = vadd.f32 %v1747_v38, %v1572_v40  ;;  %v1576_v44 = vpop.f32.mrb[15].mxu1  ;;  %v3058_v38 = vld [vmem:[#allocation11 + $0x1f4] ss:$8 sps:$4 sm:$0xff]   ;;  %v1857_v60 = vrot.slane %v1848_v58, %v3373_v36 }
 0x1bf   :  { %v1765_v45 = vadd.f32 %v1751_v11, %v1574_v42  ;;  %v1754_v42 = vsub.s32 2, %v3362_v25 }
 0x1c0   :  { %vm1768_vm3 = vcmp.gt.f32.partialorder %v1764_v22, 0.0  ;;  %v1772_v46 = vmul.f32 0.2, %v1764_v22 }
 0x1c1   :  { %v1773_v47 = vmul.f32 0.2, %v1765_v45  ;;  %vm1769_vm4 = vcmp.gt.f32.partialorder %v1765_v45, 0.0 }
 0x1c2   :  { %v1776_v48 = vsel %vm1768_vm3, %v1764_v22, %v1772_v46  ;;  %v3383_v63 = vpop.f32.mrb[12].mxu0 }
 0x1c3   :  { %v1777_v49 = vsel %vm1769_vm4, %v1765_v45, %v1773_v47  ;;  %v1780_v52 = vpack.c.bf16 %v1776_v48, %v1776_v48  ;;  %v3385_v1 = vpop.f32.mrb[13].mxu0 }
 0x1c4   :  { %v1781_v50 = vpack.c.bf16 %v1777_v49, %v1777_v49  ;;  %v1739_v4 = vpop.f32.mrb[14].mxu0 }
 0x1c5   :  { %v1740_v6 = vpop.f32.mrb[15].mxu0 }
 0x1c6   :  { %2212 = vmatprep.mubr.bf16.mxu0 %v1781_v50 }
 0x1c7   :  { %2213 = vmatmul.mubr.bf16.vlgmr.msra.gmra.mrb[16].mxu0 %v1780_v52 }
 0x1c8   :  { %2222 = vmatpush1.bf16.msra.mxu0 %v3011_v51 }
 0x1c9   :  { %2223 = vmatprep.subr.bf16.mxu0 %v3016_v53 }
 0x1cc   :  { %2224 = vmatpush1.bf16.msra.mxu0 %v3014_v0 }
 0x1cd   :  { %2225 = vmatprep.subr.bf16.mxu0 %v3019_v54 }
 0x1d0   :  { %2226 = vmatpush1.bf16.msra.mxu0 %v3017_v57 }
 0x1d1   :  { %2227 = vmatprep.subr.bf16.mxu0 %v3022_v59  ;;  %v1853_v59 = vrot.slane %v1848_v58, %v3365_v32 }
 0x1d4   :  { %2228 = vmatpush1.bf16.msra.mxu0 %v3020_v61 }
 0x1d5   :  { %2229 = vmatprep.subr.bf16.mxu0 %v3025_v62 }
 0x1d8   :  { %2230 = vmatpush1.bf16.msra.mxu0 %v3023_v2 }
 0x1d9   :  { %2231 = vmatprep.subr.bf16.mxu0 %v3028_v5 }
 0x1dc   :  { %2232 = vmatpush1.bf16.msra.mxu0 %v3026_v7 }
 0x1dd   :  { %2233 = vmatprep.subr.bf16.mxu0 %v3031_v8 }
 0x1e0   :  { %2234 = vmatpush1.bf16.msra.mxu0 %v3029_v9 }
 0x1e1   :  { %2235 = vmatprep.subr.bf16.mxu0 %v3034_v10 }
 0x1e4   :  { %2236 = vmatpush1.bf16.msra.mxu0 %v3032_v12 }
 0x1e5   :  { %2237 = vmatprep.subr.bf16.mxu0 %v3037_v13 }
 0x1e8   :  { %2238 = vmatpush1.bf16.msra.mxu0 %v3035_v14 }
 0x1e9   :  { %2239 = vmatprep.subr.bf16.mxu0 %v3040_v15 }
 0x1ec   :  { %2240 = vmatpush1.bf16.msra.mxu0 %v3038_v16 }
 0x1ed   :  { %2241 = vmatprep.subr.bf16.mxu0 %v3043_v17 }
 0x1f0   :  { %2242 = vmatpush1.bf16.msra.mxu0 %v3041_v18 }
 0x1f1   :  { %2243 = vmatprep.subr.bf16.mxu0 %v3046_v19 }
 0x1f4   :  { %2244 = vmatpush1.bf16.msra.mxu0 %v3044_v20 }
 0x1f5   :  { %2245 = vmatprep.subr.bf16.mxu0 %v3049_v21 }
 0x1f8   :  { %2246 = vmatpush1.bf16.msra.mxu0 %v3047_v23 }
 0x1f9   :  { %2247 = vmatprep.subr.bf16.mxu0 %v3052_v24 }
 0x1fb   :  { %v1612_v28 = vpop.f32.mrb[16].mxu1 }
 0x1fc   :  { %v1613_v29 = vadd.f32 %v1612_v28, %v3357_v37  ;;  %v1614_v34 = vpop.f32.mrb[17].mxu1  ;;  %2248 = vmatpush1.bf16.msra.mxu0 %v3050_v26  ;;  %v1758_v37 = vsub.s32 3, %v3362_v25 }
 0x1fd   :  { %v1615_v31 = vadd.f32 %v1614_v34, %v3359_v3  ;;  %v1616_v33 = vpop.f32.mrb[18].mxu1  ;;  %2249 = vmatprep.subr.bf16.mxu0 %v3055_v27  ;;  %v1755_v3 = vrot.slane %v3370_v35, %v1754_v42 }
 0x1fe   :  { %v1654_v39 = vadd.f32 %v3379_v55, %v1613_v29  ;;  %v1617_v11 = vpop.f32.mrb[19].mxu1  ;;  %v1759_v46 = vrot.slane %v3370_v35, %v1758_v37  ;;  %v2268_v35 = vld [vmem:[%s3429_s7] sm:$0x3] }
 0x1ff   :  { %v1656_v40 = vadd.f32 %v3381_v56, %v1615_v31  ;;  %v2279_v57 = vrot.slane %v2268_v35, %v3373_v36  ;;  %v2275_v9 = vrot.slane %v2268_v35, %v3365_v32  ;;  %v2270_v36 = vstv %s3430_s8 }
 0x200   :  { %2250 = vmatpush1.bf16.msra.mxu0 %v3053_v30 }
 0x201   :  { %2251 = vmatprep.subr.bf16.mxu0 %v3058_v38  ;;  %2346 = vmatprep.mubr.f32.mxu1 %v2279_v57 }
 0x204   :  { %2252 = vmatpush1.bf16.msra.mxu0 %v3056_v41 }
 0x23b   :  { %v1694_v43 = vpop.f32.mrb[20].mxu1 }
 0x23c   :  { %v1695_v22 = vadd.f32 %v1694_v43, %v1654_v39  ;;  %v1696_v44 = vpop.f32.mrb[21].mxu1 }
 0x23d   :  { %v1697_v45 = vadd.f32 %v1696_v44, %v1656_v40  ;;  %v1698_v47 = vpop.f32.mrb[22].mxu1 }
 0x23e   :  { %v1736_v48 = vadd.f32 %v3383_v63, %v1695_v22  ;;  %v1699_v49 = vpop.f32.mrb[23].mxu1 }
 0x23f   :  { %v1738_v50 = vadd.f32 %v3385_v1, %v1697_v45 }
 0x240   :  { %v1766_v51 = vadd.f32 %v1755_v3, %v1736_v48 }
 0x241   :  { %v1767_v52 = vadd.f32 %v1759_v46, %v1738_v50 }
 0x242   :  { %vm1770_vm5 = vcmp.gt.f32.partialorder %v1766_v51, 0.0  ;;  %v1774_v53 = vmul.f32 0.2, %v1766_v51 }
 0x243   :  { %vm1771_vm6 = vcmp.gt.f32.partialorder %v1767_v52, 0.0  ;;  %v1775_v25 = vmul.f32 0.2, %v1767_v52 }
 0x244   :  { %v1778_v0 = vsel %vm1770_vm5, %v1766_v51, %v1774_v53 }
 0x245   :  { %v1779_v54 = vsel %vm1771_vm6, %v1767_v52, %v1775_v25  ;;  %v1782_v56 = vpack.c.bf16 %v1778_v0, %v1778_v0 }
 0x246   :  { %v1783_v55 = vpack.c.bf16 %v1779_v54, %v1779_v54 }
 0x248   :  { %2253 = vmatprep.mubr.bf16.mxu0 %v1783_v55 }
 0x249   :  { %2254 = vmatmul.mubr.bf16.vlgmr.msra.gmra.mrb[16].mxu0 %v1782_v56 }
 0x31c   :  { %v2255_v61 = vpop.f32.mrb[16].mxu0 }
 0x31d   :  { %v2646_v62 = vadd.f32 %v2255_v61, %v1853_v59  ;;  %v2257_v63 = vpop.f32.mrb[17].mxu0 }
 0x31e   :  { %v2647_v1 = vadd.f32 %v2257_v63, %v1857_v60  ;;  %v2259_v2 = vpop.f32.mrb[18].mxu0 }
 0x31f   :  { %v2264_v4 = vmul.f32 0.2, %v2646_v62  ;;  %v2260_v5 = vpop.f32.mrb[19].mxu0  ;;  %vm2262_vm7 = vcmp.gt.f32.partialorder %v2646_v62, 0.0 }
 0x320   :  { %v2265_v6 = vmul.f32 0.2, %v2647_v1  ;;  %vm2263_vm8 = vcmp.gt.f32.partialorder %v2647_v1, 0.0 }
 0x321   :  { %v2266_v8 = vsel %vm2262_vm7, %v2646_v62, %v2264_v4 }
 0x322   :  { %v2267_v7 = vsel %vm2263_vm8, %v2647_v1, %v2265_v6 }
 0x323   :  { %2282 = vmatprep.subr.mxu1 %v2267_v7 }
 0x324   :  { %2283 = vmatpush1.xpose.msra.mxu1 %v2266_v8 }
 0x327   :  { %2347 = vmatmul.mubr.f32.vlgmr.msra.gmra.mrb[24].mxu1 %v2275_v9 }
 0x3fa   :  { %v2348_v10 = vpop.f32.mrb[24].mxu1 }
 0x3fb   :  { %v2349_v12 = vadd.f32 %v2348_v10, %v2270_v36  ;;  %v2350_v13 = vpop.f32.mrb[25].mxu1 }
 0x3fd   :  { %v2352_v14 = vsub.f32 0.0, %v2349_v12 }
 0x3ff   :  { %v2353_v15 = vmul.f32 1.442695, %v2352_v14 }
 0x401   :  { %3059 = vpow2.f32 %v2353_v15 }
 0x40b   :  { %v3060_v16 = vpop.eup %3059 }
 0x40c   :  { %v2355_v17 = vadd.f32 1.0, %v3060_v16 }
 0x40e   :  { %3061 = vrcp.f32 %v2355_v17 }
 0x418   :  { %v3062_v32 = vpop.eup %3061 }
 0x419   :  { %2358 = vst.msk [vmem:[#allocation12] sm:$0x1] %vm2357_vm9, %v3062_v32 }
 0x41a   :  { %3184 = shalt.err (!%p3181_p2)
}
 0x41b   :  { %s3185_s15 = scalar_lea.hbm %s3431_s9, 16 }
 0x41c   :  { %p3186_p3 = scmp.ne.s32.totalorder %s3431_s9, %s3185_s15  ;;  %p3189_p4 = scmp.lt.u32.totalorder %s3185_s15, %s3431_s9 }
 0x41e   :  { %p3191_p5 = pnand %p3189_p4, %p3186_p3 }
 0x420   :  { %3194 = shalt.err (!%p3191_p5)
}
 0x421   :  { %2368 = dma.vmem_to_hbm [thread:$0]  %s2366_s11, 16, %s3431_s9, [#allocation5]  }
 0x422   :  { %3201 = dma.done.wait [#allocation5], 16  }
 0x423   :  { %3202 = vsyncadd [#allocation5], 4294967280 }
 0x424   :  { %2372 = vsyncpa [#allocation4], 1 }
 0x425   :  { %2373 = vsyncpa [#allocation7], 1 }
 0x426   :  { %2374 = vsyncpa [#allocation10], 1 }
 0x427   :  { %2375 = vsyncpa [#allocation5], 1 }

</bundles_post_ra>
